<compile_context>
chip_gen: v7x
topology: tpu7x:2x2x1
jax: 0.10.0
libtpu: 0.0.40
codegen_flags: <defaults>
</compile_context>

<pallas_src>
import jax
import jax.numpy as jnp
from jax import lax
from jax.experimental import pallas as pl
from jax.experimental.pallas import tpu as pltpu

# small, forward-consistent shapes
B, TD, TE = 2, 8, 16          # batch, decoder seq, encoder seq
D, H, DH = 32, 4, 8           # d_model, heads, head dim
DFF, V = 64, 128              # ffn hidden, vocab
HD = H * DH                   # fused head width (= 32)
BT, BE = B * TD, B * TE       # stacked decoder / encoder rows
EPS = 1e-6
NEG = -1e9

# power-of-two shifts for the stacked-batch block structure built in-kernel
TD_SHIFT = TD.bit_length() - 1          # 3
TE_SHIFT = TE.bit_length() - 1          # 4
assert (1 << TD_SHIFT) == TD and (1 << TE_SHIFT) == TE

# packed weight slab: each weight starts on a 128-lane boundary (free views)
SLAB_ROWS, SLAB_COLS = 64, 8 * 128
_SQKV, _SO, _CQ, _CKV, _CO, _WI, _WF, _LM = (i * 128 for i in range(8))


# ----------------------------- kernel ---------------------------------------
def _decoder_kernel(ids_ref, mask_ref, emb_ref, slab_ref, ln_ref, enc_ref,
                    out_ref):
    f32, bf16 = jnp.float32, jnp.bfloat16

    ln = ln_ref[...]                     # (4, D)  f32 RMSNorm weights
    enc = enc_ref[...]                   # (BE, D) bf16 encoder states (stacked)

    # ---- fused weight slab: static 128-lane-aligned views (single DMA) ----
    w_sqkv = slab_ref[0:D,   _SQKV:_SQKV + 3 * HD]   # [Wq | Wk | Wv]
    w_so   = slab_ref[0:HD,  _SO:_SO + D]
    w_cq   = slab_ref[0:D,   _CQ:_CQ + HD]
    w_ckv  = slab_ref[0:D,   _CKV:_CKV + 2 * HD]     # cross [Wk | Wv]
    w_co   = slab_ref[0:HD,  _CO:_CO + D]
    w_i    = slab_ref[0:D,   _WI:_WI + DFF]
    w_f    = slab_ref[0:DFF, _WF:_WF + D]
    w_lm   = slab_ref[0:D,   _LM:_LM + V]

    # ---- embedding lookup in-kernel: one_hot(ids) @ emb (MXU) ----
    row_i = lax.broadcasted_iota(jnp.int32, (BT, V), 0)
    col_i = lax.broadcasted_iota(jnp.int32, (BT, V), 1)
    onehot = jnp.zeros((BT, V), f32)
    for i in range(BT):                               # BT=16 tiny static loop
        onehot = jnp.where((row_i == i) & (col_i == ids_ref[i]), 1.0, onehot)
    x = jnp.dot(onehot, emb_ref[...], preferred_element_type=f32)   # (BT, D)

    # ---- attention biases built in-kernel (no bias DMAs) ----
    r = lax.broadcasted_iota(jnp.int32, (BT, BT), 0)
    c = lax.broadcasted_iota(jnp.int32, (BT, BT), 1)
    same_batch = (r >> TD_SHIFT) == (c >> TD_SHIFT)
    causal = (r & (TD - 1)) >= (c & (TD - 1))
    self_bias = jnp.where(same_batch & causal, 0.0, NEG)
    for j in range(BT):                               # fold decoder padding
        pad_j = (1 - mask_ref[j]).astype(f32) * NEG   # 0 keep / NEG masked
        self_bias = self_bias + jnp.where(c == j, pad_j, 0.0)

    rq = lax.broadcasted_iota(jnp.int32, (BT, BE), 0)
    ce = lax.broadcasted_iota(jnp.int32, (BT, BE), 1)
    # wrapper semantics: encoder_attention_mask = all-ones, so only the
    # stacked-batch block structure is masked along the encoder axis.
    cross_bias = jnp.where((rq >> TD_SHIFT) == (ce >> TE_SHIFT), 0.0, NEG)

    def rms(h, w_row):                   # T5 RMSNorm, f32 on the VPU
        var = jnp.mean(h * h, axis=-1, keepdims=True)
        return h * lax.rsqrt(var + EPS) * w_row

    def softmax(s):                      # f32; reciprocal goes to the EUP slot
        m = jnp.max(s, axis=-1, keepdims=True)
        e = jnp.exp(s - m)
        return e * pl.reciprocal(jnp.sum(e, axis=-1, keepdims=True), approx=True)

    def mha(q, k, v, bias, wo):
        # Per-head QK^T / PV with the output projection folded into the loop:
        # sum_h head_h @ Wo[h*DH:(h+1)*DH, :]  ==  concat(heads) @ Wo.
        # Removes the lane-granularity concatenate entirely.
        out = jnp.zeros((BT, D), f32)
        for hh in range(H):
            lo = hh * DH
            s = lax.dot_general(q[:, lo:lo + DH], k[:, lo:lo + DH],
                                (((1,), (1,)), ((), ())),
                                preferred_element_type=f32)
            # NOTE: T5 does not scale attention logits by sqrt(d_head).
            p = softmax(s + bias)
            head = jnp.dot(p.astype(bf16), v[:, lo:lo + DH],
                           preferred_element_type=f32)
            out = out + jnp.dot(head.astype(bf16), wo[lo:lo + DH, :],
                                preferred_element_type=f32)
        return out                                    # (BT, D) f32

    # ---- self attention (causal + padding, block-diagonal over batch) ----
    h = rms(x, ln[0:1, :]).astype(bf16)
    qkv = jnp.dot(h, w_sqkv, preferred_element_type=f32)          # (BT, 3*HD)
    q = qkv[:, 0 * HD:1 * HD].astype(bf16)
    k = qkv[:, 1 * HD:2 * HD].astype(bf16)
    v = qkv[:, 2 * HD:3 * HD].astype(bf16)
    x = x + mha(q, k, v, self_bias, w_so)

    # ---- cross attention (encoder mask forced to all-ones by the wrapper) ----
    h = rms(x, ln[1:2, :]).astype(bf16)
    qc = jnp.dot(h, w_cq, preferred_element_type=f32).astype(bf16)
    kv = jnp.dot(enc, w_ckv, preferred_element_type=f32)
    kc = kv[:, 0:HD].astype(bf16)
    vc = kv[:, HD:2 * HD].astype(bf16)
    x = x + mha(qc, kc, vc, cross_bias, w_co)

    # ---- feed forward (T5 DenseReluDense) ----
    h = rms(x, ln[2:3, :]).astype(bf16)
    f = jnp.maximum(jnp.dot(h, w_i, preferred_element_type=f32), 0.0)
    x = x + jnp.dot(f.astype(bf16), w_f, preferred_element_type=f32)

    # ---- final norm + lm head (lane-dense (BT, V) = (16, 128) output) ----
    h = rms(x, ln[3:4, :]).astype(bf16)
    out_ref[...] = jnp.dot(h, w_lm,
                           preferred_element_type=f32).astype(out_ref.dtype)


# ----------------------------- wrapper ---------------------------------------
@jax.jit
def dual_t5_decoder_forward(params, input_ids, attention_mask,
                            encoder_hidden_states):
    """DualT5DecoderWrapper.forward: rebuild encoder_attention_mask = ones
    (realized as unmasked-within-batch cross attention) and run the decoder
    on (input_ids, attention_mask, encoder_hidden_states)."""
    ids = input_ids.reshape(BT).astype(jnp.int32)          # scalar-prefetch
    msk = attention_mask.reshape(BT).astype(jnp.int32)     # scalar-prefetch
    enc = encoder_hidden_states.reshape(BE, D).astype(jnp.bfloat16)

    grid_spec = pltpu.PrefetchScalarGridSpec(
        num_scalar_prefetch=2,
        grid=(1,),
        in_specs=[
            pl.BlockSpec((V, D), lambda i, ids, msk: (0, 0)),           # emb
            pl.BlockSpec((SLAB_ROWS, SLAB_COLS),
                         lambda i, ids, msk: (0, 0)),                   # slab
            pl.BlockSpec((4, D), lambda i, ids, msk: (0, 0)),           # ln
            pl.BlockSpec((BE, D), lambda i, ids, msk: (0, 0)),          # enc
        ],
        out_specs=pl.BlockSpec((BT, V), lambda i, ids, msk: (0, 0)),
    )
    out = pl.pallas_call(
        _decoder_kernel,
        grid_spec=grid_spec,
        out_shape=jax.ShapeDtypeStruct((BT, V), jnp.float32),
        compiler_params=pltpu.CompilerParams(
            dimension_semantics=("arbitrary",)),
    )(ids, msk, params["emb"], params["w_slab"], params["ln"], enc)
    return out.reshape(B, TD, V)


# ----------------------------- params / reference ----------------------------
def init_params(key):
    ks = jax.random.split(key, 9)
    s = 0.05
    n = lambda k, shape: jax.random.normal(k, shape, jnp.float32) * s
    bf = jnp.bfloat16
    p = {
        "emb":    n(ks[0], (V, D)),                      # f32 embedding table
        # fused, lane-dense attention / ffn projections (bf16 for the MXU)
        "w_sqkv": n(ks[1], (D, 3 * HD)).astype(bf),      # [Wq | Wk | Wv]
        "w_so":   n(ks[2], (HD, D)).astype(bf),
        "w_cq":   n(ks[3], (D, HD)).astype(bf),
        "w_ckv":  n(ks[4], (D, 2 * HD)).astype(bf),      # cross [Wk | Wv]
        "w_co":   n(ks[5], (HD, D)).astype(bf),
        "w_i":    n(ks[6], (D, DFF)).astype(bf),
        "w_f":    n(ks[7], (DFF, D)).astype(bf),
        "ln":     jnp.ones((4, D), jnp.float32),
        "w_lm":   n(ks[8], (D, V)).astype(bf),
    }
    # pack every bf16 weight into one slab, 128-lane-aligned column blocks
    slab = jnp.zeros((SLAB_ROWS, SLAB_COLS), bf)

    def put(sl, w, off):
        r, cdim = w.shape
        return sl.at[0:r, off:off + cdim].set(w)

    slab = put(slab, p["w_sqkv"], _SQKV)
    slab = put(slab, p["w_so"], _SO)
    slab = put(slab, p["w_cq"], _CQ)
    slab = put(slab, p["w_ckv"], _CKV)
    slab = put(slab, p["w_co"], _CO)
    slab = put(slab, p["w_i"], _WI)
    slab = put(slab, p["w_f"], _WF)
    slab = put(slab, p["w_lm"], _LM)
    p["w_slab"] = slab
    return p


def _reference_single(x, enc, mask_row, p):
    hp = lax.Precision.HIGHEST
    ln = p["ln"]

    def rms(h, w):
        return h * lax.rsqrt(jnp.mean(h * h, -1, keepdims=True) + EPS) * w

    def attn(q, k, v, bias):
        q = q.reshape(q.shape[0], H, DH)
        k = k.reshape(k.shape[0], H, DH)
        v = v.reshape(v.shape[0], H, DH)
        s = jnp.einsum("thd,shd->hts", q, k, precision=hp)
        if bias is not None:
            s = s + bias[None]
        pw = jax.nn.softmax(s, axis=-1)
        a = jnp.einsum("hts,shd->thd", pw, v, precision=hp)
        return a.reshape(a.shape[0], HD)

    row = jnp.arange(TD)
    allowed = (row[None, :] <= row[:, None]) & (mask_row[None, :] > 0.5)
    sbias = jnp.where(allowed, 0.0, NEG)

    h = rms(x, ln[0])
    qkv = jnp.dot(h, p["w_sqkv"], precision=hp)
    q, k, v = qkv[:, :HD], qkv[:, HD:2 * HD], qkv[:, 2 * HD:]
    x = x + jnp.dot(attn(q, k, v, sbias), p["w_so"], precision=hp)

    h = rms(x, ln[1])
    qc = jnp.dot(h, p["w_cq"], precision=hp)
    kv = jnp.dot(enc, p["w_ckv"], precision=hp)
    kc, vc = kv[:, :HD], kv[:, HD:]
    x = x + jnp.dot(attn(qc, kc, vc, None), p["w_co"], precision=hp)

    h = rms(x, ln[2])
    x = x + jnp.dot(jnp.maximum(jnp.dot(h, p["w_i"], precision=hp), 0.0),
                    p["w_f"], precision=hp)
    return jnp.dot(rms(x, ln[3]), p["w_lm"], precision=hp)


def reference(params, input_ids, attention_mask, enc):
    p = {k: v.astype(jnp.float32) for k, v in params.items()}
    x = p["emb"][input_ids]
    mask = attention_mask.astype(jnp.float32)
    return jax.vmap(lambda xi, ei, mi: _reference_single(xi, ei, mi, p))(
        x, enc, mask)


# ----------------------------- main ------------------------------------------
if __name__ == "__main__":
    key = jax.random.PRNGKey(0)
    kp, k1, k2 = jax.random.split(key, 3)
    params = init_params(kp)

    input_ids = jax.random.randint(k1, (B, TD), 0, V, dtype=jnp.int32)
    attention_mask = jnp.ones((B, TD), jnp.int32).at[1, 6:].set(0)
    encoder_hidden_states = jax.random.normal(k2, (B, TE, D), jnp.float32)

    out = dual_t5_decoder_forward(params, input_ids, attention_mask,
                                  encoder_hidden_states)
    out = jax.block_until_ready(out)

    ref = reference(params, input_ids, attention_mask, encoder_hidden_states)
    assert out.shape == (B, TD, V), out.shape
    # kernel uses bf16 MXU inputs / bf16 encoder states (f32 accumulation) and
    # an approx reciprocal; reference is full-f32 HIGHEST precision -> compare
    # at bf16-level tolerance.
    assert jnp.allclose(out, ref, atol=3e-2, rtol=3e-2), (
        "mismatch vs reference: max abs diff = %g"
        % float(jnp.max(jnp.abs(out - ref))))
    print("KERNEL_OK")
</pallas_src>

<mosaic_0001>
module attributes {stable_mosaic.version = 11 : i64} {
  func.func @_decoder_kernel(%arg0: i32, %arg1: memref<16xi32, #tpu.memory_space<smem>>, %arg2: memref<16xi32, #tpu.memory_space<smem>>, %arg3: memref<128x32xf32, #tpu.memory_space<vmem>>, %arg4: memref<64x1024xbf16, #tpu.memory_space<vmem>>, %arg5: memref<4x32xf32, #tpu.memory_space<vmem>>, %arg6: memref<32x32xbf16, #tpu.memory_space<vmem>>, %arg7: memref<16x128xf32, #tpu.memory_space<vmem>>) attributes {dimension_semantics = [#tpu.dimension_semantics<arbitrary>], iteration_bounds = array<i64: 1>, scalar_prefetch = 2 : i64, scratch_operands = 0 : i64, tpu.core_type = #tpu.core_type<tc>, window_params = [{pipeline_mode = #tpu.pipeline_mode<synchronous>, transform_indices = @transform_0, window_bounds = array<i64: 128, 32>}, {pipeline_mode = #tpu.pipeline_mode<synchronous>, transform_indices = @transform_1, window_bounds = array<i64: 64, 1024>}, {pipeline_mode = #tpu.pipeline_mode<synchronous>, transform_indices = @transform_2, window_bounds = array<i64: 4, 32>}, {pipeline_mode = #tpu.pipeline_mode<synchronous>, transform_indices = @transform_3, window_bounds = array<i64: 32, 32>}, {pipeline_mode = #tpu.pipeline_mode<synchronous>, transform_indices = @transform_4, window_bounds = array<i64: 16, 128>}]} {
    %c0 = arith.constant 0 : index
    %c0_0 = arith.constant 0 : index
    %0 = vector.load %arg5[%c0, %c0_0] : memref<4x32xf32, #tpu.memory_space<vmem>>, vector<4x32xf32>
    %c0_1 = arith.constant 0 : index
    %c0_2 = arith.constant 0 : index
    %1 = vector.load %arg6[%c0_1, %c0_2] : memref<32x32xbf16, #tpu.memory_space<vmem>>, vector<32x32xbf16>
    %c0_3 = arith.constant 0 : index
    %c0_4 = arith.constant 0 : index
    %2 = vector.load %arg4[%c0_3, %c0_4] : memref<64x1024xbf16, #tpu.memory_space<vmem>>, vector<32x96xbf16>
    %c0_5 = arith.constant 0 : index
    %c128 = arith.constant 128 : index
    %3 = vector.load %arg4[%c0_5, %c128] : memref<64x1024xbf16, #tpu.memory_space<vmem>>, vector<32x32xbf16>
    %c0_6 = arith.constant 0 : index
    %c256 = arith.constant 256 : index
    %4 = vector.load %arg4[%c0_6, %c256] : memref<64x1024xbf16, #tpu.memory_space<vmem>>, vector<32x32xbf16>
    %c0_7 = arith.constant 0 : index
    %c384 = arith.constant 384 : index
    %5 = vector.load %arg4[%c0_7, %c384] : memref<64x1024xbf16, #tpu.memory_space<vmem>>, vector<32x64xbf16>
    %c0_8 = arith.constant 0 : index
    %c512 = arith.constant 512 : index
    %6 = vector.load %arg4[%c0_8, %c512] : memref<64x1024xbf16, #tpu.memory_space<vmem>>, vector<32x32xbf16>
    %c0_9 = arith.constant 0 : index
    %c640 = arith.constant 640 : index
    %7 = vector.load %arg4[%c0_9, %c640] : memref<64x1024xbf16, #tpu.memory_space<vmem>>, vector<32x64xbf16>
    %c0_10 = arith.constant 0 : index
    %c768 = arith.constant 768 : index
    %8 = vector.load %arg4[%c0_10, %c768] : memref<64x1024xbf16, #tpu.memory_space<vmem>>, vector<64x32xbf16>
    %c0_11 = arith.constant 0 : index
    %c896 = arith.constant 896 : index
    %9 = vector.load %arg4[%c0_11, %c896] : memref<64x1024xbf16, #tpu.memory_space<vmem>>, vector<32x128xbf16>
    %10 = tpu.iota {dimensions = array<i32: 0>} : vector<16x128xi32>
    %11 = tpu.iota {dimensions = array<i32: 1>} : vector<16x128xi32>
    %cst = arith.constant 0.000000e+00 : f32
    %12 = vector.broadcast %cst : f32 to vector<16x128xf32>
    %c0_i32 = arith.constant 0 : i32
    %13 = vector.broadcast %c0_i32 : i32 to vector<16x128xi32>
    %14 = arith.cmpi eq, %10, %13 : vector<16x128xi32>
    %c0_12 = arith.constant 0 : index
    %15 = memref.load %arg1[%c0_12] : memref<16xi32, #tpu.memory_space<smem>>
    %16 = vector.broadcast %15 : i32 to vector<16x128xi32>
    %17 = arith.cmpi eq, %11, %16 : vector<16x128xi32>
    %18 = arith.andi %14, %17 : vector<16x128xi1>
    %cst_13 = arith.constant 1.000000e+00 : f32
    %19 = vector.broadcast %cst_13 : f32 to vector<16x128xf32>
    %20 = arith.select %18, %19, %12 : vector<16x128xi1>, vector<16x128xf32>
    %c1_i32 = arith.constant 1 : i32
    %21 = vector.broadcast %c1_i32 : i32 to vector<16x128xi32>
    %22 = arith.cmpi eq, %10, %21 : vector<16x128xi32>
    %c1 = arith.constant 1 : index
    %23 = memref.load %arg1[%c1] : memref<16xi32, #tpu.memory_space<smem>>
    %24 = vector.broadcast %23 : i32 to vector<16x128xi32>
    %25 = arith.cmpi eq, %11, %24 : vector<16x128xi32>
    %26 = arith.andi %22, %25 : vector<16x128xi1>
    %cst_14 = arith.constant 1.000000e+00 : f32
    %27 = vector.broadcast %cst_14 : f32 to vector<16x128xf32>
    %28 = arith.select %26, %27, %20 : vector<16x128xi1>, vector<16x128xf32>
    %c2_i32 = arith.constant 2 : i32
    %29 = vector.broadcast %c2_i32 : i32 to vector<16x128xi32>
    %30 = arith.cmpi eq, %10, %29 : vector<16x128xi32>
    %c2 = arith.constant 2 : index
    %31 = memref.load %arg1[%c2] : memref<16xi32, #tpu.memory_space<smem>>
    %32 = vector.broadcast %31 : i32 to vector<16x128xi32>
    %33 = arith.cmpi eq, %11, %32 : vector<16x128xi32>
    %34 = arith.andi %30, %33 : vector<16x128xi1>
    %cst_15 = arith.constant 1.000000e+00 : f32
    %35 = vector.broadcast %cst_15 : f32 to vector<16x128xf32>
    %36 = arith.select %34, %35, %28 : vector<16x128xi1>, vector<16x128xf32>
    %c3_i32 = arith.constant 3 : i32
    %37 = vector.broadcast %c3_i32 : i32 to vector<16x128xi32>
    %38 = arith.cmpi eq, %10, %37 : vector<16x128xi32>
    %c3 = arith.constant 3 : index
    %39 = memref.load %arg1[%c3] : memref<16xi32, #tpu.memory_space<smem>>
    %40 = vector.broadcast %39 : i32 to vector<16x128xi32>
    %41 = arith.cmpi eq, %11, %40 : vector<16x128xi32>
    %42 = arith.andi %38, %41 : vector<16x128xi1>
    %cst_16 = arith.constant 1.000000e+00 : f32
    %43 = vector.broadcast %cst_16 : f32 to vector<16x128xf32>
    %44 = arith.select %42, %43, %36 : vector<16x128xi1>, vector<16x128xf32>
    %c4_i32 = arith.constant 4 : i32
    %45 = vector.broadcast %c4_i32 : i32 to vector<16x128xi32>
    %46 = arith.cmpi eq, %10, %45 : vector<16x128xi32>
    %c4 = arith.constant 4 : index
    %47 = memref.load %arg1[%c4] : memref<16xi32, #tpu.memory_space<smem>>
    %48 = vector.broadcast %47 : i32 to vector<16x128xi32>
    %49 = arith.cmpi eq, %11, %48 : vector<16x128xi32>
    %50 = arith.andi %46, %49 : vector<16x128xi1>
    %cst_17 = arith.constant 1.000000e+00 : f32
    %51 = vector.broadcast %cst_17 : f32 to vector<16x128xf32>
    %52 = arith.select %50, %51, %44 : vector<16x128xi1>, vector<16x128xf32>
    %c5_i32 = arith.constant 5 : i32
    %53 = vector.broadcast %c5_i32 : i32 to vector<16x128xi32>
    %54 = arith.cmpi eq, %10, %53 : vector<16x128xi32>
    %c5 = arith.constant 5 : index
    %55 = memref.load %arg1[%c5] : memref<16xi32, #tpu.memory_space<smem>>
    %56 = vector.broadcast %55 : i32 to vector<16x128xi32>
    %57 = arith.cmpi eq, %11, %56 : vector<16x128xi32>
    %58 = arith.andi %54, %57 : vector<16x128xi1>
    %cst_18 = arith.constant 1.000000e+00 : f32
    %59 = vector.broadcast %cst_18 : f32 to vector<16x128xf32>
    %60 = arith.select %58, %59, %52 : vector<16x128xi1>, vector<16x128xf32>
    %c6_i32 = arith.constant 6 : i32
    %61 = vector.broadcast %c6_i32 : i32 to vector<16x128xi32>
    %62 = arith.cmpi eq, %10, %61 : vector<16x128xi32>
    %c6 = arith.constant 6 : index
    %63 = memref.load %arg1[%c6] : memref<16xi32, #tpu.memory_space<smem>>
    %64 = vector.broadcast %63 : i32 to vector<16x128xi32>
    %65 = arith.cmpi eq, %11, %64 : vector<16x128xi32>
    %66 = arith.andi %62, %65 : vector<16x128xi1>
    %cst_19 = arith.constant 1.000000e+00 : f32
    %67 = vector.broadcast %cst_19 : f32 to vector<16x128xf32>
    %68 = arith.select %66, %67, %60 : vector<16x128xi1>, vector<16x128xf32>
    %c7_i32 = arith.constant 7 : i32
    %69 = vector.broadcast %c7_i32 : i32 to vector<16x128xi32>
    %70 = arith.cmpi eq, %10, %69 : vector<16x128xi32>
    %c7 = arith.constant 7 : index
    %71 = memref.load %arg1[%c7] : memref<16xi32, #tpu.memory_space<smem>>
    %72 = vector.broadcast %71 : i32 to vector<16x128xi32>
    %73 = arith.cmpi eq, %11, %72 : vector<16x128xi32>
    %74 = arith.andi %70, %73 : vector<16x128xi1>
    %cst_20 = arith.constant 1.000000e+00 : f32
    %75 = vector.broadcast %cst_20 : f32 to vector<16x128xf32>
    %76 = arith.select %74, %75, %68 : vector<16x128xi1>, vector<16x128xf32>
    %c8_i32 = arith.constant 8 : i32
    %77 = vector.broadcast %c8_i32 : i32 to vector<16x128xi32>
    %78 = arith.cmpi eq, %10, %77 : vector<16x128xi32>
    %c8 = arith.constant 8 : index
    %79 = memref.load %arg1[%c8] : memref<16xi32, #tpu.memory_space<smem>>
    %80 = vector.broadcast %79 : i32 to vector<16x128xi32>
    %81 = arith.cmpi eq, %11, %80 : vector<16x128xi32>
    %82 = arith.andi %78, %81 : vector<16x128xi1>
    %cst_21 = arith.constant 1.000000e+00 : f32
    %83 = vector.broadcast %cst_21 : f32 to vector<16x128xf32>
    %84 = arith.select %82, %83, %76 : vector<16x128xi1>, vector<16x128xf32>
    %c9_i32 = arith.constant 9 : i32
    %85 = vector.broadcast %c9_i32 : i32 to vector<16x128xi32>
    %86 = arith.cmpi eq, %10, %85 : vector<16x128xi32>
    %c9 = arith.constant 9 : index
    %87 = memref.load %arg1[%c9] : memref<16xi32, #tpu.memory_space<smem>>
    %88 = vector.broadcast %87 : i32 to vector<16x128xi32>
    %89 = arith.cmpi eq, %11, %88 : vector<16x128xi32>
    %90 = arith.andi %86, %89 : vector<16x128xi1>
    %cst_22 = arith.constant 1.000000e+00 : f32
    %91 = vector.broadcast %cst_22 : f32 to vector<16x128xf32>
    %92 = arith.select %90, %91, %84 : vector<16x128xi1>, vector<16x128xf32>
    %c10_i32 = arith.constant 10 : i32
    %93 = vector.broadcast %c10_i32 : i32 to vector<16x128xi32>
    %94 = arith.cmpi eq, %10, %93 : vector<16x128xi32>
    %c10 = arith.constant 10 : index
    %95 = memref.load %arg1[%c10] : memref<16xi32, #tpu.memory_space<smem>>
    %96 = vector.broadcast %95 : i32 to vector<16x128xi32>
    %97 = arith.cmpi eq, %11, %96 : vector<16x128xi32>
    %98 = arith.andi %94, %97 : vector<16x128xi1>
    %cst_23 = arith.constant 1.000000e+00 : f32
    %99 = vector.broadcast %cst_23 : f32 to vector<16x128xf32>
    %100 = arith.select %98, %99, %92 : vector<16x128xi1>, vector<16x128xf32>
    %c11_i32 = arith.constant 11 : i32
    %101 = vector.broadcast %c11_i32 : i32 to vector<16x128xi32>
    %102 = arith.cmpi eq, %10, %101 : vector<16x128xi32>
    %c11 = arith.constant 11 : index
    %103 = memref.load %arg1[%c11] : memref<16xi32, #tpu.memory_space<smem>>
    %104 = vector.broadcast %103 : i32 to vector<16x128xi32>
    %105 = arith.cmpi eq, %11, %104 : vector<16x128xi32>
    %106 = arith.andi %102, %105 : vector<16x128xi1>
    %cst_24 = arith.constant 1.000000e+00 : f32
    %107 = vector.broadcast %cst_24 : f32 to vector<16x128xf32>
    %108 = arith.select %106, %107, %100 : vector<16x128xi1>, vector<16x128xf32>
    %c12_i32 = arith.constant 12 : i32
    %109 = vector.broadcast %c12_i32 : i32 to vector<16x128xi32>
    %110 = arith.cmpi eq, %10, %109 : vector<16x128xi32>
    %c12 = arith.constant 12 : index
    %111 = memref.load %arg1[%c12] : memref<16xi32, #tpu.memory_space<smem>>
    %112 = vector.broadcast %111 : i32 to vector<16x128xi32>
    %113 = arith.cmpi eq, %11, %112 : vector<16x128xi32>
    %114 = arith.andi %110, %113 : vector<16x128xi1>
    %cst_25 = arith.constant 1.000000e+00 : f32
    %115 = vector.broadcast %cst_25 : f32 to vector<16x128xf32>
    %116 = arith.select %114, %115, %108 : vector<16x128xi1>, vector<16x128xf32>
    %c13_i32 = arith.constant 13 : i32
    %117 = vector.broadcast %c13_i32 : i32 to vector<16x128xi32>
    %118 = arith.cmpi eq, %10, %117 : vector<16x128xi32>
    %c13 = arith.constant 13 : index
    %119 = memref.load %arg1[%c13] : memref<16xi32, #tpu.memory_space<smem>>
    %120 = vector.broadcast %119 : i32 to vector<16x128xi32>
    %121 = arith.cmpi eq, %11, %120 : vector<16x128xi32>
    %122 = arith.andi %118, %121 : vector<16x128xi1>
    %cst_26 = arith.constant 1.000000e+00 : f32
    %123 = vector.broadcast %cst_26 : f32 to vector<16x128xf32>
    %124 = arith.select %122, %123, %116 : vector<16x128xi1>, vector<16x128xf32>
    %c14_i32 = arith.constant 14 : i32
    %125 = vector.broadcast %c14_i32 : i32 to vector<16x128xi32>
    %126 = arith.cmpi eq, %10, %125 : vector<16x128xi32>
    %c14 = arith.constant 14 : index
    %127 = memref.load %arg1[%c14] : memref<16xi32, #tpu.memory_space<smem>>
    %128 = vector.broadcast %127 : i32 to vector<16x128xi32>
    %129 = arith.cmpi eq, %11, %128 : vector<16x128xi32>
    %130 = arith.andi %126, %129 : vector<16x128xi1>
    %cst_27 = arith.constant 1.000000e+00 : f32
    %131 = vector.broadcast %cst_27 : f32 to vector<16x128xf32>
    %132 = arith.select %130, %131, %124 : vector<16x128xi1>, vector<16x128xf32>
    %c15_i32 = arith.constant 15 : i32
    %133 = vector.broadcast %c15_i32 : i32 to vector<16x128xi32>
    %134 = arith.cmpi eq, %10, %133 : vector<16x128xi32>
    %c15 = arith.constant 15 : index
    %135 = memref.load %arg1[%c15] : memref<16xi32, #tpu.memory_space<smem>>
    %136 = vector.broadcast %135 : i32 to vector<16x128xi32>
    %137 = arith.cmpi eq, %11, %136 : vector<16x128xi32>
    %138 = arith.andi %134, %137 : vector<16x128xi1>
    %cst_28 = arith.constant 1.000000e+00 : f32
    %139 = vector.broadcast %cst_28 : f32 to vector<16x128xf32>
    %140 = arith.select %138, %139, %132 : vector<16x128xi1>, vector<16x128xf32>
    %c0_29 = arith.constant 0 : index
    %c0_30 = arith.constant 0 : index
    %141 = vector.load %arg3[%c0_29, %c0_30] : memref<128x32xf32, #tpu.memory_space<vmem>>, vector<128x32xf32>
    %cst_31 = arith.constant dense<0.000000e+00> : vector<16x32xf32>
    %142 = tpu.matmul %140, %141, %cst_31 {dimension_numbers = #tpu.dot_dimension_numbers<[1], [0], [0], [1], [0, 0, 1, 1], [], []>} : vector<16x128xf32>, vector<128x32xf32>, vector<16x32xf32> -> vector<16x32xf32>
    %143 = tpu.iota {dimensions = array<i32: 0>} : vector<16x16xi32>
    %144 = tpu.iota {dimensions = array<i32: 1>} : vector<16x16xi32>
    %c3_i32_32 = arith.constant 3 : i32
    %145 = vector.broadcast %c3_i32_32 : i32 to vector<16x16xi32>
    %146 = arith.shrsi %143, %145 : vector<16x16xi32>
    %c3_i32_33 = arith.constant 3 : i32
    %147 = vector.broadcast %c3_i32_33 : i32 to vector<16x16xi32>
    %148 = arith.shrsi %144, %147 : vector<16x16xi32>
    %149 = arith.cmpi eq, %146, %148 : vector<16x16xi32>
    %c7_i32_34 = arith.constant 7 : i32
    %150 = vector.broadcast %c7_i32_34 : i32 to vector<16x16xi32>
    %151 = arith.andi %143, %150 : vector<16x16xi32>
    %c7_i32_35 = arith.constant 7 : i32
    %152 = vector.broadcast %c7_i32_35 : i32 to vector<16x16xi32>
    %153 = arith.andi %144, %152 : vector<16x16xi32>
    %154 = arith.cmpi sge, %151, %153 : vector<16x16xi32>
    %155 = arith.andi %149, %154 : vector<16x16xi1>
    %cst_36 = arith.constant 0.000000e+00 : f32
    %cst_37 = arith.constant -1.000000e+09 : f32
    %156 = vector.broadcast %cst_36 : f32 to vector<16x16xf32>
    %157 = vector.broadcast %cst_37 : f32 to vector<16x16xf32>
    %158 = arith.select %155, %156, %157 : vector<16x16xi1>, vector<16x16xf32>
    %c0_38 = arith.constant 0 : index
    %159 = memref.load %arg2[%c0_38] : memref<16xi32, #tpu.memory_space<smem>>
    %c1_i32_39 = arith.constant 1 : i32
    %160 = arith.subi %c1_i32_39, %159 : i32
    %161 = arith.sitofp %160 : i32 to f32
    %cst_40 = arith.constant -1.000000e+09 : f32
    %162 = arith.mulf %161, %cst_40 : f32
    %c0_i32_41 = arith.constant 0 : i32
    %163 = vector.broadcast %c0_i32_41 : i32 to vector<16x16xi32>
    %164 = arith.cmpi eq, %144, %163 : vector<16x16xi32>
    %cst_42 = arith.constant 0.000000e+00 : f32
    %165 = vector.broadcast %162 : f32 to vector<16x16xf32>
    %166 = vector.broadcast %cst_42 : f32 to vector<16x16xf32>
    %167 = arith.select %164, %165, %166 : vector<16x16xi1>, vector<16x16xf32>
    %168 = arith.addf %158, %167 : vector<16x16xf32>
    %c1_43 = arith.constant 1 : index
    %169 = memref.load %arg2[%c1_43] : memref<16xi32, #tpu.memory_space<smem>>
    %c1_i32_44 = arith.constant 1 : i32
    %170 = arith.subi %c1_i32_44, %169 : i32
    %171 = arith.sitofp %170 : i32 to f32
    %cst_45 = arith.constant -1.000000e+09 : f32
    %172 = arith.mulf %171, %cst_45 : f32
    %c1_i32_46 = arith.constant 1 : i32
    %173 = vector.broadcast %c1_i32_46 : i32 to vector<16x16xi32>
    %174 = arith.cmpi eq, %144, %173 : vector<16x16xi32>
    %cst_47 = arith.constant 0.000000e+00 : f32
    %175 = vector.broadcast %172 : f32 to vector<16x16xf32>
    %176 = vector.broadcast %cst_47 : f32 to vector<16x16xf32>
    %177 = arith.select %174, %175, %176 : vector<16x16xi1>, vector<16x16xf32>
    %178 = arith.addf %168, %177 : vector<16x16xf32>
    %c2_48 = arith.constant 2 : index
    %179 = memref.load %arg2[%c2_48] : memref<16xi32, #tpu.memory_space<smem>>
    %c1_i32_49 = arith.constant 1 : i32
    %180 = arith.subi %c1_i32_49, %179 : i32
    %181 = arith.sitofp %180 : i32 to f32
    %cst_50 = arith.constant -1.000000e+09 : f32
    %182 = arith.mulf %181, %cst_50 : f32
    %c2_i32_51 = arith.constant 2 : i32
    %183 = vector.broadcast %c2_i32_51 : i32 to vector<16x16xi32>
    %184 = arith.cmpi eq, %144, %183 : vector<16x16xi32>
    %cst_52 = arith.constant 0.000000e+00 : f32
    %185 = vector.broadcast %182 : f32 to vector<16x16xf32>
    %186 = vector.broadcast %cst_52 : f32 to vector<16x16xf32>
    %187 = arith.select %184, %185, %186 : vector<16x16xi1>, vector<16x16xf32>
    %188 = arith.addf %178, %187 : vector<16x16xf32>
    %c3_53 = arith.constant 3 : index
    %189 = memref.load %arg2[%c3_53] : memref<16xi32, #tpu.memory_space<smem>>
    %c1_i32_54 = arith.constant 1 : i32
    %190 = arith.subi %c1_i32_54, %189 : i32
    %191 = arith.sitofp %190 : i32 to f32
    %cst_55 = arith.constant -1.000000e+09 : f32
    %192 = arith.mulf %191, %cst_55 : f32
    %c3_i32_56 = arith.constant 3 : i32
    %193 = vector.broadcast %c3_i32_56 : i32 to vector<16x16xi32>
    %194 = arith.cmpi eq, %144, %193 : vector<16x16xi32>
    %cst_57 = arith.constant 0.000000e+00 : f32
    %195 = vector.broadcast %192 : f32 to vector<16x16xf32>
    %196 = vector.broadcast %cst_57 : f32 to vector<16x16xf32>
    %197 = arith.select %194, %195, %196 : vector<16x16xi1>, vector<16x16xf32>
    %198 = arith.addf %188, %197 : vector<16x16xf32>
    %c4_58 = arith.constant 4 : index
    %199 = memref.load %arg2[%c4_58] : memref<16xi32, #tpu.memory_space<smem>>
    %c1_i32_59 = arith.constant 1 : i32
    %200 = arith.subi %c1_i32_59, %199 : i32
    %201 = arith.sitofp %200 : i32 to f32
    %cst_60 = arith.constant -1.000000e+09 : f32
    %202 = arith.mulf %201, %cst_60 : f32
    %c4_i32_61 = arith.constant 4 : i32
    %203 = vector.broadcast %c4_i32_61 : i32 to vector<16x16xi32>
    %204 = arith.cmpi eq, %144, %203 : vector<16x16xi32>
    %cst_62 = arith.constant 0.000000e+00 : f32
    %205 = vector.broadcast %202 : f32 to vector<16x16xf32>
    %206 = vector.broadcast %cst_62 : f32 to vector<16x16xf32>
    %207 = arith.select %204, %205, %206 : vector<16x16xi1>, vector<16x16xf32>
    %208 = arith.addf %198, %207 : vector<16x16xf32>
    %c5_63 = arith.constant 5 : index
    %209 = memref.load %arg2[%c5_63] : memref<16xi32, #tpu.memory_space<smem>>
    %c1_i32_64 = arith.constant 1 : i32
    %210 = arith.subi %c1_i32_64, %209 : i32
    %211 = arith.sitofp %210 : i32 to f32
    %cst_65 = arith.constant -1.000000e+09 : f32
    %212 = arith.mulf %211, %cst_65 : f32
    %c5_i32_66 = arith.constant 5 : i32
    %213 = vector.broadcast %c5_i32_66 : i32 to vector<16x16xi32>
    %214 = arith.cmpi eq, %144, %213 : vector<16x16xi32>
    %cst_67 = arith.constant 0.000000e+00 : f32
    %215 = vector.broadcast %212 : f32 to vector<16x16xf32>
    %216 = vector.broadcast %cst_67 : f32 to vector<16x16xf32>
    %217 = arith.select %214, %215, %216 : vector<16x16xi1>, vector<16x16xf32>
    %218 = arith.addf %208, %217 : vector<16x16xf32>
    %c6_68 = arith.constant 6 : index
    %219 = memref.load %arg2[%c6_68] : memref<16xi32, #tpu.memory_space<smem>>
    %c1_i32_69 = arith.constant 1 : i32
    %220 = arith.subi %c1_i32_69, %219 : i32
    %221 = arith.sitofp %220 : i32 to f32
    %cst_70 = arith.constant -1.000000e+09 : f32
    %222 = arith.mulf %221, %cst_70 : f32
    %c6_i32_71 = arith.constant 6 : i32
    %223 = vector.broadcast %c6_i32_71 : i32 to vector<16x16xi32>
    %224 = arith.cmpi eq, %144, %223 : vector<16x16xi32>
    %cst_72 = arith.constant 0.000000e+00 : f32
    %225 = vector.broadcast %222 : f32 to vector<16x16xf32>
    %226 = vector.broadcast %cst_72 : f32 to vector<16x16xf32>
    %227 = arith.select %224, %225, %226 : vector<16x16xi1>, vector<16x16xf32>
    %228 = arith.addf %218, %227 : vector<16x16xf32>
    %c7_73 = arith.constant 7 : index
    %229 = memref.load %arg2[%c7_73] : memref<16xi32, #tpu.memory_space<smem>>
    %c1_i32_74 = arith.constant 1 : i32
    %230 = arith.subi %c1_i32_74, %229 : i32
    %231 = arith.sitofp %230 : i32 to f32
    %cst_75 = arith.constant -1.000000e+09 : f32
    %232 = arith.mulf %231, %cst_75 : f32
    %c7_i32_76 = arith.constant 7 : i32
    %233 = vector.broadcast %c7_i32_76 : i32 to vector<16x16xi32>
    %234 = arith.cmpi eq, %144, %233 : vector<16x16xi32>
    %cst_77 = arith.constant 0.000000e+00 : f32
    %235 = vector.broadcast %232 : f32 to vector<16x16xf32>
    %236 = vector.broadcast %cst_77 : f32 to vector<16x16xf32>
    %237 = arith.select %234, %235, %236 : vector<16x16xi1>, vector<16x16xf32>
    %238 = arith.addf %228, %237 : vector<16x16xf32>
    %c8_78 = arith.constant 8 : index
    %239 = memref.load %arg2[%c8_78] : memref<16xi32, #tpu.memory_space<smem>>
    %c1_i32_79 = arith.constant 1 : i32
    %240 = arith.subi %c1_i32_79, %239 : i32
    %241 = arith.sitofp %240 : i32 to f32
    %cst_80 = arith.constant -1.000000e+09 : f32
    %242 = arith.mulf %241, %cst_80 : f32
    %c8_i32_81 = arith.constant 8 : i32
    %243 = vector.broadcast %c8_i32_81 : i32 to vector<16x16xi32>
    %244 = arith.cmpi eq, %144, %243 : vector<16x16xi32>
    %cst_82 = arith.constant 0.000000e+00 : f32
    %245 = vector.broadcast %242 : f32 to vector<16x16xf32>
    %246 = vector.broadcast %cst_82 : f32 to vector<16x16xf32>
    %247 = arith.select %244, %245, %246 : vector<16x16xi1>, vector<16x16xf32>
    %248 = arith.addf %238, %247 : vector<16x16xf32>
    %c9_83 = arith.constant 9 : index
    %249 = memref.load %arg2[%c9_83] : memref<16xi32, #tpu.memory_space<smem>>
    %c1_i32_84 = arith.constant 1 : i32
    %250 = arith.subi %c1_i32_84, %249 : i32
    %251 = arith.sitofp %250 : i32 to f32
    %cst_85 = arith.constant -1.000000e+09 : f32
    %252 = arith.mulf %251, %cst_85 : f32
    %c9_i32_86 = arith.constant 9 : i32
    %253 = vector.broadcast %c9_i32_86 : i32 to vector<16x16xi32>
    %254 = arith.cmpi eq, %144, %253 : vector<16x16xi32>
    %cst_87 = arith.constant 0.000000e+00 : f32
    %255 = vector.broadcast %252 : f32 to vector<16x16xf32>
    %256 = vector.broadcast %cst_87 : f32 to vector<16x16xf32>
    %257 = arith.select %254, %255, %256 : vector<16x16xi1>, vector<16x16xf32>
    %258 = arith.addf %248, %257 : vector<16x16xf32>
    %c10_88 = arith.constant 10 : index
    %259 = memref.load %arg2[%c10_88] : memref<16xi32, #tpu.memory_space<smem>>
    %c1_i32_89 = arith.constant 1 : i32
    %260 = arith.subi %c1_i32_89, %259 : i32
    %261 = arith.sitofp %260 : i32 to f32
    %cst_90 = arith.constant -1.000000e+09 : f32
    %262 = arith.mulf %261, %cst_90 : f32
    %c10_i32_91 = arith.constant 10 : i32
    %263 = vector.broadcast %c10_i32_91 : i32 to vector<16x16xi32>
    %264 = arith.cmpi eq, %144, %263 : vector<16x16xi32>
    %cst_92 = arith.constant 0.000000e+00 : f32
    %265 = vector.broadcast %262 : f32 to vector<16x16xf32>
    %266 = vector.broadcast %cst_92 : f32 to vector<16x16xf32>
    %267 = arith.select %264, %265, %266 : vector<16x16xi1>, vector<16x16xf32>
    %268 = arith.addf %258, %267 : vector<16x16xf32>
    %c11_93 = arith.constant 11 : index
    %269 = memref.load %arg2[%c11_93] : memref<16xi32, #tpu.memory_space<smem>>
    %c1_i32_94 = arith.constant 1 : i32
    %270 = arith.subi %c1_i32_94, %269 : i32
    %271 = arith.sitofp %270 : i32 to f32
    %cst_95 = arith.constant -1.000000e+09 : f32
    %272 = arith.mulf %271, %cst_95 : f32
    %c11_i32_96 = arith.constant 11 : i32
    %273 = vector.broadcast %c11_i32_96 : i32 to vector<16x16xi32>
    %274 = arith.cmpi eq, %144, %273 : vector<16x16xi32>
    %cst_97 = arith.constant 0.000000e+00 : f32
    %275 = vector.broadcast %272 : f32 to vector<16x16xf32>
    %276 = vector.broadcast %cst_97 : f32 to vector<16x16xf32>
    %277 = arith.select %274, %275, %276 : vector<16x16xi1>, vector<16x16xf32>
    %278 = arith.addf %268, %277 : vector<16x16xf32>
    %c12_98 = arith.constant 12 : index
    %279 = memref.load %arg2[%c12_98] : memref<16xi32, #tpu.memory_space<smem>>
    %c1_i32_99 = arith.constant 1 : i32
    %280 = arith.subi %c1_i32_99, %279 : i32
    %281 = arith.sitofp %280 : i32 to f32
    %cst_100 = arith.constant -1.000000e+09 : f32
    %282 = arith.mulf %281, %cst_100 : f32
    %c12_i32_101 = arith.constant 12 : i32
    %283 = vector.broadcast %c12_i32_101 : i32 to vector<16x16xi32>
    %284 = arith.cmpi eq, %144, %283 : vector<16x16xi32>
    %cst_102 = arith.constant 0.000000e+00 : f32
    %285 = vector.broadcast %282 : f32 to vector<16x16xf32>
    %286 = vector.broadcast %cst_102 : f32 to vector<16x16xf32>
    %287 = arith.select %284, %285, %286 : vector<16x16xi1>, vector<16x16xf32>
    %288 = arith.addf %278, %287 : vector<16x16xf32>
    %c13_103 = arith.constant 13 : index
    %289 = memref.load %arg2[%c13_103] : memref<16xi32, #tpu.memory_space<smem>>
    %c1_i32_104 = arith.constant 1 : i32
    %290 = arith.subi %c1_i32_104, %289 : i32
    %291 = arith.sitofp %290 : i32 to f32
    %cst_105 = arith.constant -1.000000e+09 : f32
    %292 = arith.mulf %291, %cst_105 : f32
    %c13_i32_106 = arith.constant 13 : i32
    %293 = vector.broadcast %c13_i32_106 : i32 to vector<16x16xi32>
    %294 = arith.cmpi eq, %144, %293 : vector<16x16xi32>
    %cst_107 = arith.constant 0.000000e+00 : f32
    %295 = vector.broadcast %292 : f32 to vector<16x16xf32>
    %296 = vector.broadcast %cst_107 : f32 to vector<16x16xf32>
    %297 = arith.select %294, %295, %296 : vector<16x16xi1>, vector<16x16xf32>
    %298 = arith.addf %288, %297 : vector<16x16xf32>
    %c14_108 = arith.constant 14 : index
    %299 = memref.load %arg2[%c14_108] : memref<16xi32, #tpu.memory_space<smem>>
    %c1_i32_109 = arith.constant 1 : i32
    %300 = arith.subi %c1_i32_109, %299 : i32
    %301 = arith.sitofp %300 : i32 to f32
    %cst_110 = arith.constant -1.000000e+09 : f32
    %302 = arith.mulf %301, %cst_110 : f32
    %c14_i32_111 = arith.constant 14 : i32
    %303 = vector.broadcast %c14_i32_111 : i32 to vector<16x16xi32>
    %304 = arith.cmpi eq, %144, %303 : vector<16x16xi32>
    %cst_112 = arith.constant 0.000000e+00 : f32
    %305 = vector.broadcast %302 : f32 to vector<16x16xf32>
    %306 = vector.broadcast %cst_112 : f32 to vector<16x16xf32>
    %307 = arith.select %304, %305, %306 : vector<16x16xi1>, vector<16x16xf32>
    %308 = arith.addf %298, %307 : vector<16x16xf32>
    %c15_113 = arith.constant 15 : index
    %309 = memref.load %arg2[%c15_113] : memref<16xi32, #tpu.memory_space<smem>>
    %c1_i32_114 = arith.constant 1 : i32
    %310 = arith.subi %c1_i32_114, %309 : i32
    %311 = arith.sitofp %310 : i32 to f32
    %cst_115 = arith.constant -1.000000e+09 : f32
    %312 = arith.mulf %311, %cst_115 : f32
    %c15_i32_116 = arith.constant 15 : i32
    %313 = vector.broadcast %c15_i32_116 : i32 to vector<16x16xi32>
    %314 = arith.cmpi eq, %144, %313 : vector<16x16xi32>
    %cst_117 = arith.constant 0.000000e+00 : f32
    %315 = vector.broadcast %312 : f32 to vector<16x16xf32>
    %316 = vector.broadcast %cst_117 : f32 to vector<16x16xf32>
    %317 = arith.select %314, %315, %316 : vector<16x16xi1>, vector<16x16xf32>
    %318 = arith.addf %308, %317 : vector<16x16xf32>
    %319 = tpu.iota {dimensions = array<i32: 0>} : vector<16x32xi32>
    %320 = tpu.iota {dimensions = array<i32: 1>} : vector<16x32xi32>
    %c3_i32_118 = arith.constant 3 : i32
    %321 = vector.broadcast %c3_i32_118 : i32 to vector<16x32xi32>
    %322 = arith.shrsi %319, %321 : vector<16x32xi32>
    %c4_i32_119 = arith.constant 4 : i32
    %323 = vector.broadcast %c4_i32_119 : i32 to vector<16x32xi32>
    %324 = arith.shrsi %320, %323 : vector<16x32xi32>
    %325 = arith.cmpi eq, %322, %324 : vector<16x32xi32>
    %cst_120 = arith.constant 0.000000e+00 : f32
    %cst_121 = arith.constant -1.000000e+09 : f32
    %326 = vector.broadcast %cst_120 : f32 to vector<16x32xf32>
    %327 = vector.broadcast %cst_121 : f32 to vector<16x32xf32>
    %328 = arith.select %325, %326, %327 : vector<16x32xi1>, vector<16x32xf32>
    %329 = vector.extract_strided_slice %0 {offsets = [0, 0], sizes = [1, 32], strides = [1, 1]} : vector<4x32xf32> to vector<1x32xf32>
    %330 = arith.mulf %142, %142 : vector<16x32xf32>
    %cst_122 = arith.constant dense<0.000000e+00> : vector<16xf32>
    %331 = vector.multi_reduction <add>, %330, %cst_122 [1] : vector<16x32xf32> to vector<16xf32>
    %332 = vector.shape_cast %331 : vector<16xf32> to vector<16x1xf32>
    %cst_123 = arith.constant 3.200000e+01 : f32
    %333 = vector.broadcast %cst_123 : f32 to vector<16x1xf32>
    %334 = arith.divf %332, %333 : vector<16x1xf32>
    %cst_124 = arith.constant 9.99999997E-7 : f32
    %335 = vector.broadcast %cst_124 : f32 to vector<16x1xf32>
    %336 = arith.addf %334, %335 : vector<16x1xf32>
    %337 = math.rsqrt %336 : vector<16x1xf32>
    %338 = vector.broadcast %337 : vector<16x1xf32> to vector<16x32xf32>
    %339 = arith.mulf %142, %338 : vector<16x32xf32>
    %340 = vector.broadcast %329 : vector<1x32xf32> to vector<16x32xf32>
    %341 = arith.mulf %339, %340 : vector<16x32xf32>
    %342 = arith.truncf %341 : vector<16x32xf32> to vector<16x32xbf16>
    %cst_125 = arith.constant dense<0.000000e+00> : vector<16x96xf32>
    %343 = tpu.matmul %342, %2, %cst_125 {dimension_numbers = #tpu.dot_dimension_numbers<[1], [0], [0], [1], [0, 0, 1, 1], [], []>} : vector<16x32xbf16>, vector<32x96xbf16>, vector<16x96xf32> -> vector<16x96xf32>
    %344 = vector.extract_strided_slice %343 {offsets = [0, 0], sizes = [16, 32], strides = [1, 1]} : vector<16x96xf32> to vector<16x32xf32>
    %345 = arith.truncf %344 : vector<16x32xf32> to vector<16x32xbf16>
    %346 = vector.extract_strided_slice %343 {offsets = [0, 32], sizes = [16, 32], strides = [1, 1]} : vector<16x96xf32> to vector<16x32xf32>
    %347 = arith.truncf %346 : vector<16x32xf32> to vector<16x32xbf16>
    %348 = vector.extract_strided_slice %343 {offsets = [0, 64], sizes = [16, 32], strides = [1, 1]} : vector<16x96xf32> to vector<16x32xf32>
    %349 = arith.truncf %348 : vector<16x32xf32> to vector<16x32xbf16>
    %cst_126 = arith.constant 0.000000e+00 : f32
    %350 = vector.broadcast %cst_126 : f32 to vector<16x32xf32>
    %351 = vector.extract_strided_slice %345 {offsets = [0, 0], sizes = [16, 8], strides = [1, 1]} : vector<16x32xbf16> to vector<16x8xbf16>
    %352 = vector.extract_strided_slice %347 {offsets = [0, 0], sizes = [16, 8], strides = [1, 1]} : vector<16x32xbf16> to vector<16x8xbf16>
    %cst_127 = arith.constant dense<0.000000e+00> : vector<16x16xf32>
    %353 = tpu.matmul %351, %352, %cst_127 {dimension_numbers = #tpu.dot_dimension_numbers<[1], [1], [0], [0], [0, 0, 1, 0], [], []>} : vector<16x8xbf16>, vector<16x8xbf16>, vector<16x16xf32> -> vector<16x16xf32>
    %354 = arith.addf %353, %318 : vector<16x16xf32>
    %cst_128 = arith.constant dense<0xFF800000> : vector<16xf32>
    %355 = vector.multi_reduction <maximumf>, %354, %cst_128 [1] : vector<16x16xf32> to vector<16xf32>
    %356 = vector.shape_cast %355 : vector<16xf32> to vector<16x1xf32>
    %357 = vector.broadcast %356 : vector<16x1xf32> to vector<16x16xf32>
    %358 = arith.subf %354, %357 : vector<16x16xf32>
    %359 = math.exp %358 : vector<16x16xf32>
    %cst_129 = arith.constant dense<0.000000e+00> : vector<16xf32>
    %360 = vector.multi_reduction <add>, %359, %cst_129 [1] : vector<16x16xf32> to vector<16xf32>
    %361 = vector.shape_cast %360 : vector<16xf32> to vector<16x1xf32>
    %362 = tpu.reciprocal %361 {approx = true} : vector<16x1xf32> -> vector<16x1xf32>
    %363 = vector.broadcast %362 : vector<16x1xf32> to vector<16x16xf32>
    %364 = arith.mulf %359, %363 : vector<16x16xf32>
    %365 = arith.truncf %364 : vector<16x16xf32> to vector<16x16xbf16>
    %366 = vector.extract_strided_slice %349 {offsets = [0, 0], sizes = [16, 8], strides = [1, 1]} : vector<16x32xbf16> to vector<16x8xbf16>
    %cst_130 = arith.constant dense<0.000000e+00> : vector<16x8xf32>
    %367 = tpu.matmul %365, %366, %cst_130 {dimension_numbers = #tpu.dot_dimension_numbers<[1], [0], [0], [1], [0, 0, 1, 1], [], []>} : vector<16x16xbf16>, vector<16x8xbf16>, vector<16x8xf32> -> vector<16x8xf32>
    %368 = arith.truncf %367 : vector<16x8xf32> to vector<16x8xbf16>
    %369 = vector.extract_strided_slice %3 {offsets = [0, 0], sizes = [8, 32], strides = [1, 1]} : vector<32x32xbf16> to vector<8x32xbf16>
    %cst_131 = arith.constant dense<0.000000e+00> : vector<16x32xf32>
    %370 = tpu.matmul %368, %369, %cst_131 {dimension_numbers = #tpu.dot_dimension_numbers<[1], [0], [0], [1], [0, 0, 1, 1], [], []>} : vector<16x8xbf16>, vector<8x32xbf16>, vector<16x32xf32> -> vector<16x32xf32>
    %371 = arith.addf %350, %370 : vector<16x32xf32>
    %372 = vector.extract_strided_slice %345 {offsets = [0, 8], sizes = [16, 8], strides = [1, 1]} : vector<16x32xbf16> to vector<16x8xbf16>
    %373 = vector.extract_strided_slice %347 {offsets = [0, 8], sizes = [16, 8], strides = [1, 1]} : vector<16x32xbf16> to vector<16x8xbf16>
    %cst_132 = arith.constant dense<0.000000e+00> : vector<16x16xf32>
    %374 = tpu.matmul %372, %373, %cst_132 {dimension_numbers = #tpu.dot_dimension_numbers<[1], [1], [0], [0], [0, 0, 1, 0], [], []>} : vector<16x8xbf16>, vector<16x8xbf16>, vector<16x16xf32> -> vector<16x16xf32>
    %375 = arith.addf %374, %318 : vector<16x16xf32>
    %cst_133 = arith.constant dense<0xFF800000> : vector<16xf32>
    %376 = vector.multi_reduction <maximumf>, %375, %cst_133 [1] : vector<16x16xf32> to vector<16xf32>
    %377 = vector.shape_cast %376 : vector<16xf32> to vector<16x1xf32>
    %378 = vector.broadcast %377 : vector<16x1xf32> to vector<16x16xf32>
    %379 = arith.subf %375, %378 : vector<16x16xf32>
    %380 = math.exp %379 : vector<16x16xf32>
    %cst_134 = arith.constant dense<0.000000e+00> : vector<16xf32>
    %381 = vector.multi_reduction <add>, %380, %cst_134 [1] : vector<16x16xf32> to vector<16xf32>
    %382 = vector.shape_cast %381 : vector<16xf32> to vector<16x1xf32>
    %383 = tpu.reciprocal %382 {approx = true} : vector<16x1xf32> -> vector<16x1xf32>
    %384 = vector.broadcast %383 : vector<16x1xf32> to vector<16x16xf32>
    %385 = arith.mulf %380, %384 : vector<16x16xf32>
    %386 = arith.truncf %385 : vector<16x16xf32> to vector<16x16xbf16>
    %387 = vector.extract_strided_slice %349 {offsets = [0, 8], sizes = [16, 8], strides = [1, 1]} : vector<16x32xbf16> to vector<16x8xbf16>
    %cst_135 = arith.constant dense<0.000000e+00> : vector<16x8xf32>
    %388 = tpu.matmul %386, %387, %cst_135 {dimension_numbers = #tpu.dot_dimension_numbers<[1], [0], [0], [1], [0, 0, 1, 1], [], []>} : vector<16x16xbf16>, vector<16x8xbf16>, vector<16x8xf32> -> vector<16x8xf32>
    %389 = arith.truncf %388 : vector<16x8xf32> to vector<16x8xbf16>
    %390 = vector.extract_strided_slice %3 {offsets = [8, 0], sizes = [8, 32], strides = [1, 1]} : vector<32x32xbf16> to vector<8x32xbf16>
    %cst_136 = arith.constant dense<0.000000e+00> : vector<16x32xf32>
    %391 = tpu.matmul %389, %390, %cst_136 {dimension_numbers = #tpu.dot_dimension_numbers<[1], [0], [0], [1], [0, 0, 1, 1], [], []>} : vector<16x8xbf16>, vector<8x32xbf16>, vector<16x32xf32> -> vector<16x32xf32>
    %392 = arith.addf %371, %391 : vector<16x32xf32>
    %393 = vector.extract_strided_slice %345 {offsets = [0, 16], sizes = [16, 8], strides = [1, 1]} : vector<16x32xbf16> to vector<16x8xbf16>
    %394 = vector.extract_strided_slice %347 {offsets = [0, 16], sizes = [16, 8], strides = [1, 1]} : vector<16x32xbf16> to vector<16x8xbf16>
    %cst_137 = arith.constant dense<0.000000e+00> : vector<16x16xf32>
    %395 = tpu.matmul %393, %394, %cst_137 {dimension_numbers = #tpu.dot_dimension_numbers<[1], [1], [0], [0], [0, 0, 1, 0], [], []>} : vector<16x8xbf16>, vector<16x8xbf16>, vector<16x16xf32> -> vector<16x16xf32>
    %396 = arith.addf %395, %318 : vector<16x16xf32>
    %cst_138 = arith.constant dense<0xFF800000> : vector<16xf32>
    %397 = vector.multi_reduction <maximumf>, %396, %cst_138 [1] : vector<16x16xf32> to vector<16xf32>
    %398 = vector.shape_cast %397 : vector<16xf32> to vector<16x1xf32>
    %399 = vector.broadcast %398 : vector<16x1xf32> to vector<16x16xf32>
    %400 = arith.subf %396, %399 : vector<16x16xf32>
    %401 = math.exp %400 : vector<16x16xf32>
    %cst_139 = arith.constant dense<0.000000e+00> : vector<16xf32>
    %402 = vector.multi_reduction <add>, %401, %cst_139 [1] : vector<16x16xf32> to vector<16xf32>
    %403 = vector.shape_cast %402 : vector<16xf32> to vector<16x1xf32>
    %404 = tpu.reciprocal %403 {approx = true} : vector<16x1xf32> -> vector<16x1xf32>
    %405 = vector.broadcast %404 : vector<16x1xf32> to vector<16x16xf32>
    %406 = arith.mulf %401, %405 : vector<16x16xf32>
    %407 = arith.truncf %406 : vector<16x16xf32> to vector<16x16xbf16>
    %408 = vector.extract_strided_slice %349 {offsets = [0, 16], sizes = [16, 8], strides = [1, 1]} : vector<16x32xbf16> to vector<16x8xbf16>
    %cst_140 = arith.constant dense<0.000000e+00> : vector<16x8xf32>
    %409 = tpu.matmul %407, %408, %cst_140 {dimension_numbers = #tpu.dot_dimension_numbers<[1], [0], [0], [1], [0, 0, 1, 1], [], []>} : vector<16x16xbf16>, vector<16x8xbf16>, vector<16x8xf32> -> vector<16x8xf32>
    %410 = arith.truncf %409 : vector<16x8xf32> to vector<16x8xbf16>
    %411 = vector.extract_strided_slice %3 {offsets = [16, 0], sizes = [8, 32], strides = [1, 1]} : vector<32x32xbf16> to vector<8x32xbf16>
    %cst_141 = arith.constant dense<0.000000e+00> : vector<16x32xf32>
    %412 = tpu.matmul %410, %411, %cst_141 {dimension_numbers = #tpu.dot_dimension_numbers<[1], [0], [0], [1], [0, 0, 1, 1], [], []>} : vector<16x8xbf16>, vector<8x32xbf16>, vector<16x32xf32> -> vector<16x32xf32>
    %413 = arith.addf %392, %412 : vector<16x32xf32>
    %414 = vector.extract_strided_slice %345 {offsets = [0, 24], sizes = [16, 8], strides = [1, 1]} : vector<16x32xbf16> to vector<16x8xbf16>
    %415 = vector.extract_strided_slice %347 {offsets = [0, 24], sizes = [16, 8], strides = [1, 1]} : vector<16x32xbf16> to vector<16x8xbf16>
    %cst_142 = arith.constant dense<0.000000e+00> : vector<16x16xf32>
    %416 = tpu.matmul %414, %415, %cst_142 {dimension_numbers = #tpu.dot_dimension_numbers<[1], [1], [0], [0], [0, 0, 1, 0], [], []>} : vector<16x8xbf16>, vector<16x8xbf16>, vector<16x16xf32> -> vector<16x16xf32>
    %417 = arith.addf %416, %318 : vector<16x16xf32>
    %cst_143 = arith.constant dense<0xFF800000> : vector<16xf32>
    %418 = vector.multi_reduction <maximumf>, %417, %cst_143 [1] : vector<16x16xf32> to vector<16xf32>
    %419 = vector.shape_cast %418 : vector<16xf32> to vector<16x1xf32>
    %420 = vector.broadcast %419 : vector<16x1xf32> to vector<16x16xf32>
    %421 = arith.subf %417, %420 : vector<16x16xf32>
    %422 = math.exp %421 : vector<16x16xf32>
    %cst_144 = arith.constant dense<0.000000e+00> : vector<16xf32>
    %423 = vector.multi_reduction <add>, %422, %cst_144 [1] : vector<16x16xf32> to vector<16xf32>
    %424 = vector.shape_cast %423 : vector<16xf32> to vector<16x1xf32>
    %425 = tpu.reciprocal %424 {approx = true} : vector<16x1xf32> -> vector<16x1xf32>
    %426 = vector.broadcast %425 : vector<16x1xf32> to vector<16x16xf32>
    %427 = arith.mulf %422, %426 : vector<16x16xf32>
    %428 = arith.truncf %427 : vector<16x16xf32> to vector<16x16xbf16>
    %429 = vector.extract_strided_slice %349 {offsets = [0, 24], sizes = [16, 8], strides = [1, 1]} : vector<16x32xbf16> to vector<16x8xbf16>
    %cst_145 = arith.constant dense<0.000000e+00> : vector<16x8xf32>
    %430 = tpu.matmul %428, %429, %cst_145 {dimension_numbers = #tpu.dot_dimension_numbers<[1], [0], [0], [1], [0, 0, 1, 1], [], []>} : vector<16x16xbf16>, vector<16x8xbf16>, vector<16x8xf32> -> vector<16x8xf32>
    %431 = arith.truncf %430 : vector<16x8xf32> to vector<16x8xbf16>
    %432 = vector.extract_strided_slice %3 {offsets = [24, 0], sizes = [8, 32], strides = [1, 1]} : vector<32x32xbf16> to vector<8x32xbf16>
    %cst_146 = arith.constant dense<0.000000e+00> : vector<16x32xf32>
    %433 = tpu.matmul %431, %432, %cst_146 {dimension_numbers = #tpu.dot_dimension_numbers<[1], [0], [0], [1], [0, 0, 1, 1], [], []>} : vector<16x8xbf16>, vector<8x32xbf16>, vector<16x32xf32> -> vector<16x32xf32>
    %434 = arith.addf %413, %433 : vector<16x32xf32>
    %435 = arith.addf %142, %434 : vector<16x32xf32>
    %436 = vector.extract_strided_slice %0 {offsets = [1, 0], sizes = [1, 32], strides = [1, 1]} : vector<4x32xf32> to vector<1x32xf32>
    %437 = arith.mulf %435, %435 : vector<16x32xf32>
    %cst_147 = arith.constant dense<0.000000e+00> : vector<16xf32>
    %438 = vector.multi_reduction <add>, %437, %cst_147 [1] : vector<16x32xf32> to vector<16xf32>
    %439 = vector.shape_cast %438 : vector<16xf32> to vector<16x1xf32>
    %cst_148 = arith.constant 3.200000e+01 : f32
    %440 = vector.broadcast %cst_148 : f32 to vector<16x1xf32>
    %441 = arith.divf %439, %440 : vector<16x1xf32>
    %cst_149 = arith.constant 9.99999997E-7 : f32
    %442 = vector.broadcast %cst_149 : f32 to vector<16x1xf32>
    %443 = arith.addf %441, %442 : vector<16x1xf32>
    %444 = math.rsqrt %443 : vector<16x1xf32>
    %445 = vector.broadcast %444 : vector<16x1xf32> to vector<16x32xf32>
    %446 = arith.mulf %435, %445 : vector<16x32xf32>
    %447 = vector.broadcast %436 : vector<1x32xf32> to vector<16x32xf32>
    %448 = arith.mulf %446, %447 : vector<16x32xf32>
    %449 = arith.truncf %448 : vector<16x32xf32> to vector<16x32xbf16>
    %cst_150 = arith.constant dense<0.000000e+00> : vector<16x32xf32>
    %450 = tpu.matmul %449, %4, %cst_150 {dimension_numbers = #tpu.dot_dimension_numbers<[1], [0], [0], [1], [0, 0, 1, 1], [], []>} : vector<16x32xbf16>, vector<32x32xbf16>, vector<16x32xf32> -> vector<16x32xf32>
    %451 = arith.truncf %450 : vector<16x32xf32> to vector<16x32xbf16>
    %cst_151 = arith.constant dense<0.000000e+00> : vector<32x64xf32>
    %452 = tpu.matmul %1, %5, %cst_151 {dimension_numbers = #tpu.dot_dimension_numbers<[1], [0], [0], [1], [0, 0, 1, 1], [], []>} : vector<32x32xbf16>, vector<32x64xbf16>, vector<32x64xf32> -> vector<32x64xf32>
    %453 = vector.extract_strided_slice %452 {offsets = [0, 0], sizes = [32, 32], strides = [1, 1]} : vector<32x64xf32> to vector<32x32xf32>
    %454 = arith.truncf %453 : vector<32x32xf32> to vector<32x32xbf16>
    %455 = vector.extract_strided_slice %452 {offsets = [0, 32], sizes = [32, 32], strides = [1, 1]} : vector<32x64xf32> to vector<32x32xf32>
    %456 = arith.truncf %455 : vector<32x32xf32> to vector<32x32xbf16>
    %cst_152 = arith.constant 0.000000e+00 : f32
    %457 = vector.broadcast %cst_152 : f32 to vector<16x32xf32>
    %458 = vector.extract_strided_slice %451 {offsets = [0, 0], sizes = [16, 8], strides = [1, 1]} : vector<16x32xbf16> to vector<16x8xbf16>
    %459 = vector.extract_strided_slice %454 {offsets = [0, 0], sizes = [32, 8], strides = [1, 1]} : vector<32x32xbf16> to vector<32x8xbf16>
    %cst_153 = arith.constant dense<0.000000e+00> : vector<16x32xf32>
    %460 = tpu.matmul %458, %459, %cst_153 {dimension_numbers = #tpu.dot_dimension_numbers<[1], [1], [0], [0], [0, 0, 1, 0], [], []>} : vector<16x8xbf16>, vector<32x8xbf16>, vector<16x32xf32> -> vector<16x32xf32>
    %461 = arith.addf %460, %328 : vector<16x32xf32>
    %cst_154 = arith.constant dense<0xFF800000> : vector<16xf32>
    %462 = vector.multi_reduction <maximumf>, %461, %cst_154 [1] : vector<16x32xf32> to vector<16xf32>
    %463 = vector.shape_cast %462 : vector<16xf32> to vector<16x1xf32>
    %464 = vector.broadcast %463 : vector<16x1xf32> to vector<16x32xf32>
    %465 = arith.subf %461, %464 : vector<16x32xf32>
    %466 = math.exp %465 : vector<16x32xf32>
    %cst_155 = arith.constant dense<0.000000e+00> : vector<16xf32>
    %467 = vector.multi_reduction <add>, %466, %cst_155 [1] : vector<16x32xf32> to vector<16xf32>
    %468 = vector.shape_cast %467 : vector<16xf32> to vector<16x1xf32>
    %469 = tpu.reciprocal %468 {approx = true} : vector<16x1xf32> -> vector<16x1xf32>
    %470 = vector.broadcast %469 : vector<16x1xf32> to vector<16x32xf32>
    %471 = arith.mulf %466, %470 : vector<16x32xf32>
    %472 = arith.truncf %471 : vector<16x32xf32> to vector<16x32xbf16>
    %473 = vector.extract_strided_slice %456 {offsets = [0, 0], sizes = [32, 8], strides = [1, 1]} : vector<32x32xbf16> to vector<32x8xbf16>
    %cst_156 = arith.constant dense<0.000000e+00> : vector<16x8xf32>
    %474 = tpu.matmul %472, %473, %cst_156 {dimension_numbers = #tpu.dot_dimension_numbers<[1], [0], [0], [1], [0, 0, 1, 1], [], []>} : vector<16x32xbf16>, vector<32x8xbf16>, vector<16x8xf32> -> vector<16x8xf32>
    %475 = arith.truncf %474 : vector<16x8xf32> to vector<16x8xbf16>
    %476 = vector.extract_strided_slice %6 {offsets = [0, 0], sizes = [8, 32], strides = [1, 1]} : vector<32x32xbf16> to vector<8x32xbf16>
    %cst_157 = arith.constant dense<0.000000e+00> : vector<16x32xf32>
    %477 = tpu.matmul %475, %476, %cst_157 {dimension_numbers = #tpu.dot_dimension_numbers<[1], [0], [0], [1], [0, 0, 1, 1], [], []>} : vector<16x8xbf16>, vector<8x32xbf16>, vector<16x32xf32> -> vector<16x32xf32>
    %478 = arith.addf %457, %477 : vector<16x32xf32>
    %479 = vector.extract_strided_slice %451 {offsets = [0, 8], sizes = [16, 8], strides = [1, 1]} : vector<16x32xbf16> to vector<16x8xbf16>
    %480 = vector.extract_strided_slice %454 {offsets = [0, 8], sizes = [32, 8], strides = [1, 1]} : vector<32x32xbf16> to vector<32x8xbf16>
    %cst_158 = arith.constant dense<0.000000e+00> : vector<16x32xf32>
    %481 = tpu.matmul %479, %480, %cst_158 {dimension_numbers = #tpu.dot_dimension_numbers<[1], [1], [0], [0], [0, 0, 1, 0], [], []>} : vector<16x8xbf16>, vector<32x8xbf16>, vector<16x32xf32> -> vector<16x32xf32>
    %482 = arith.addf %481, %328 : vector<16x32xf32>
    %cst_159 = arith.constant dense<0xFF800000> : vector<16xf32>
    %483 = vector.multi_reduction <maximumf>, %482, %cst_159 [1] : vector<16x32xf32> to vector<16xf32>
    %484 = vector.shape_cast %483 : vector<16xf32> to vector<16x1xf32>
    %485 = vector.broadcast %484 : vector<16x1xf32> to vector<16x32xf32>
    %486 = arith.subf %482, %485 : vector<16x32xf32>
    %487 = math.exp %486 : vector<16x32xf32>
    %cst_160 = arith.constant dense<0.000000e+00> : vector<16xf32>
    %488 = vector.multi_reduction <add>, %487, %cst_160 [1] : vector<16x32xf32> to vector<16xf32>
    %489 = vector.shape_cast %488 : vector<16xf32> to vector<16x1xf32>
    %490 = tpu.reciprocal %489 {approx = true} : vector<16x1xf32> -> vector<16x1xf32>
    %491 = vector.broadcast %490 : vector<16x1xf32> to vector<16x32xf32>
    %492 = arith.mulf %487, %491 : vector<16x32xf32>
    %493 = arith.truncf %492 : vector<16x32xf32> to vector<16x32xbf16>
    %494 = vector.extract_strided_slice %456 {offsets = [0, 8], sizes = [32, 8], strides = [1, 1]} : vector<32x32xbf16> to vector<32x8xbf16>
    %cst_161 = arith.constant dense<0.000000e+00> : vector<16x8xf32>
    %495 = tpu.matmul %493, %494, %cst_161 {dimension_numbers = #tpu.dot_dimension_numbers<[1], [0], [0], [1], [0, 0, 1, 1], [], []>} : vector<16x32xbf16>, vector<32x8xbf16>, vector<16x8xf32> -> vector<16x8xf32>
    %496 = arith.truncf %495 : vector<16x8xf32> to vector<16x8xbf16>
    %497 = vector.extract_strided_slice %6 {offsets = [8, 0], sizes = [8, 32], strides = [1, 1]} : vector<32x32xbf16> to vector<8x32xbf16>
    %cst_162 = arith.constant dense<0.000000e+00> : vector<16x32xf32>
    %498 = tpu.matmul %496, %497, %cst_162 {dimension_numbers = #tpu.dot_dimension_numbers<[1], [0], [0], [1], [0, 0, 1, 1], [], []>} : vector<16x8xbf16>, vector<8x32xbf16>, vector<16x32xf32> -> vector<16x32xf32>
    %499 = arith.addf %478, %498 : vector<16x32xf32>
    %500 = vector.extract_strided_slice %451 {offsets = [0, 16], sizes = [16, 8], strides = [1, 1]} : vector<16x32xbf16> to vector<16x8xbf16>
    %501 = vector.extract_strided_slice %454 {offsets = [0, 16], sizes = [32, 8], strides = [1, 1]} : vector<32x32xbf16> to vector<32x8xbf16>
    %cst_163 = arith.constant dense<0.000000e+00> : vector<16x32xf32>
    %502 = tpu.matmul %500, %501, %cst_163 {dimension_numbers = #tpu.dot_dimension_numbers<[1], [1], [0], [0], [0, 0, 1, 0], [], []>} : vector<16x8xbf16>, vector<32x8xbf16>, vector<16x32xf32> -> vector<16x32xf32>
    %503 = arith.addf %502, %328 : vector<16x32xf32>
    %cst_164 = arith.constant dense<0xFF800000> : vector<16xf32>
    %504 = vector.multi_reduction <maximumf>, %503, %cst_164 [1] : vector<16x32xf32> to vector<16xf32>
    %505 = vector.shape_cast %504 : vector<16xf32> to vector<16x1xf32>
    %506 = vector.broadcast %505 : vector<16x1xf32> to vector<16x32xf32>
    %507 = arith.subf %503, %506 : vector<16x32xf32>
    %508 = math.exp %507 : vector<16x32xf32>
    %cst_165 = arith.constant dense<0.000000e+00> : vector<16xf32>
    %509 = vector.multi_reduction <add>, %508, %cst_165 [1] : vector<16x32xf32> to vector<16xf32>
    %510 = vector.shape_cast %509 : vector<16xf32> to vector<16x1xf32>
    %511 = tpu.reciprocal %510 {approx = true} : vector<16x1xf32> -> vector<16x1xf32>
    %512 = vector.broadcast %511 : vector<16x1xf32> to vector<16x32xf32>
    %513 = arith.mulf %508, %512 : vector<16x32xf32>
    %514 = arith.truncf %513 : vector<16x32xf32> to vector<16x32xbf16>
    %515 = vector.extract_strided_slice %456 {offsets = [0, 16], sizes = [32, 8], strides = [1, 1]} : vector<32x32xbf16> to vector<32x8xbf16>
    %cst_166 = arith.constant dense<0.000000e+00> : vector<16x8xf32>
    %516 = tpu.matmul %514, %515, %cst_166 {dimension_numbers = #tpu.dot_dimension_numbers<[1], [0], [0], [1], [0, 0, 1, 1], [], []>} : vector<16x32xbf16>, vector<32x8xbf16>, vector<16x8xf32> -> vector<16x8xf32>
    %517 = arith.truncf %516 : vector<16x8xf32> to vector<16x8xbf16>
    %518 = vector.extract_strided_slice %6 {offsets = [16, 0], sizes = [8, 32], strides = [1, 1]} : vector<32x32xbf16> to vector<8x32xbf16>
    %cst_167 = arith.constant dense<0.000000e+00> : vector<16x32xf32>
    %519 = tpu.matmul %517, %518, %cst_167 {dimension_numbers = #tpu.dot_dimension_numbers<[1], [0], [0], [1], [0, 0, 1, 1], [], []>} : vector<16x8xbf16>, vector<8x32xbf16>, vector<16x32xf32> -> vector<16x32xf32>
    %520 = arith.addf %499, %519 : vector<16x32xf32>
    %521 = vector.extract_strided_slice %451 {offsets = [0, 24], sizes = [16, 8], strides = [1, 1]} : vector<16x32xbf16> to vector<16x8xbf16>
    %522 = vector.extract_strided_slice %454 {offsets = [0, 24], sizes = [32, 8], strides = [1, 1]} : vector<32x32xbf16> to vector<32x8xbf16>
    %cst_168 = arith.constant dense<0.000000e+00> : vector<16x32xf32>
    %523 = tpu.matmul %521, %522, %cst_168 {dimension_numbers = #tpu.dot_dimension_numbers<[1], [1], [0], [0], [0, 0, 1, 0], [], []>} : vector<16x8xbf16>, vector<32x8xbf16>, vector<16x32xf32> -> vector<16x32xf32>
    %524 = arith.addf %523, %328 : vector<16x32xf32>
    %cst_169 = arith.constant dense<0xFF800000> : vector<16xf32>
    %525 = vector.multi_reduction <maximumf>, %524, %cst_169 [1] : vector<16x32xf32> to vector<16xf32>
    %526 = vector.shape_cast %525 : vector<16xf32> to vector<16x1xf32>
    %527 = vector.broadcast %526 : vector<16x1xf32> to vector<16x32xf32>
    %528 = arith.subf %524, %527 : vector<16x32xf32>
    %529 = math.exp %528 : vector<16x32xf32>
    %cst_170 = arith.constant dense<0.000000e+00> : vector<16xf32>
    %530 = vector.multi_reduction <add>, %529, %cst_170 [1] : vector<16x32xf32> to vector<16xf32>
    %531 = vector.shape_cast %530 : vector<16xf32> to vector<16x1xf32>
    %532 = tpu.reciprocal %531 {approx = true} : vector<16x1xf32> -> vector<16x1xf32>
    %533 = vector.broadcast %532 : vector<16x1xf32> to vector<16x32xf32>
    %534 = arith.mulf %529, %533 : vector<16x32xf32>
    %535 = arith.truncf %534 : vector<16x32xf32> to vector<16x32xbf16>
    %536 = vector.extract_strided_slice %456 {offsets = [0, 24], sizes = [32, 8], strides = [1, 1]} : vector<32x32xbf16> to vector<32x8xbf16>
    %cst_171 = arith.constant dense<0.000000e+00> : vector<16x8xf32>
    %537 = tpu.matmul %535, %536, %cst_171 {dimension_numbers = #tpu.dot_dimension_numbers<[1], [0], [0], [1], [0, 0, 1, 1], [], []>} : vector<16x32xbf16>, vector<32x8xbf16>, vector<16x8xf32> -> vector<16x8xf32>
    %538 = arith.truncf %537 : vector<16x8xf32> to vector<16x8xbf16>
    %539 = vector.extract_strided_slice %6 {offsets = [24, 0], sizes = [8, 32], strides = [1, 1]} : vector<32x32xbf16> to vector<8x32xbf16>
    %cst_172 = arith.constant dense<0.000000e+00> : vector<16x32xf32>
    %540 = tpu.matmul %538, %539, %cst_172 {dimension_numbers = #tpu.dot_dimension_numbers<[1], [0], [0], [1], [0, 0, 1, 1], [], []>} : vector<16x8xbf16>, vector<8x32xbf16>, vector<16x32xf32> -> vector<16x32xf32>
    %541 = arith.addf %520, %540 : vector<16x32xf32>
    %542 = arith.addf %435, %541 : vector<16x32xf32>
    %543 = vector.extract_strided_slice %0 {offsets = [2, 0], sizes = [1, 32], strides = [1, 1]} : vector<4x32xf32> to vector<1x32xf32>
    %544 = arith.mulf %542, %542 : vector<16x32xf32>
    %cst_173 = arith.constant dense<0.000000e+00> : vector<16xf32>
    %545 = vector.multi_reduction <add>, %544, %cst_173 [1] : vector<16x32xf32> to vector<16xf32>
    %546 = vector.shape_cast %545 : vector<16xf32> to vector<16x1xf32>
    %cst_174 = arith.constant 3.200000e+01 : f32
    %547 = vector.broadcast %cst_174 : f32 to vector<16x1xf32>
    %548 = arith.divf %546, %547 : vector<16x1xf32>
    %cst_175 = arith.constant 9.99999997E-7 : f32
    %549 = vector.broadcast %cst_175 : f32 to vector<16x1xf32>
    %550 = arith.addf %548, %549 : vector<16x1xf32>
    %551 = math.rsqrt %550 : vector<16x1xf32>
    %552 = vector.broadcast %551 : vector<16x1xf32> to vector<16x32xf32>
    %553 = arith.mulf %542, %552 : vector<16x32xf32>
    %554 = vector.broadcast %543 : vector<1x32xf32> to vector<16x32xf32>
    %555 = arith.mulf %553, %554 : vector<16x32xf32>
    %556 = arith.truncf %555 : vector<16x32xf32> to vector<16x32xbf16>
    %cst_176 = arith.constant dense<0.000000e+00> : vector<16x64xf32>
    %557 = tpu.matmul %556, %7, %cst_176 {dimension_numbers = #tpu.dot_dimension_numbers<[1], [0], [0], [1], [0, 0, 1, 1], [], []>} : vector<16x32xbf16>, vector<32x64xbf16>, vector<16x64xf32> -> vector<16x64xf32>
    %cst_177 = arith.constant 0.000000e+00 : f32
    %558 = vector.broadcast %cst_177 : f32 to vector<16x64xf32>
    %559 = arith.maximumf %557, %558 : vector<16x64xf32>
    %560 = arith.truncf %559 : vector<16x64xf32> to vector<16x64xbf16>
    %cst_178 = arith.constant dense<0.000000e+00> : vector<16x32xf32>
    %561 = tpu.matmul %560, %8, %cst_178 {dimension_numbers = #tpu.dot_dimension_numbers<[1], [0], [0], [1], [0, 0, 1, 1], [], []>} : vector<16x64xbf16>, vector<64x32xbf16>, vector<16x32xf32> -> vector<16x32xf32>
    %562 = arith.addf %542, %561 : vector<16x32xf32>
    %563 = vector.extract_strided_slice %0 {offsets = [3, 0], sizes = [1, 32], strides = [1, 1]} : vector<4x32xf32> to vector<1x32xf32>
    %564 = arith.mulf %562, %562 : vector<16x32xf32>
    %cst_179 = arith.constant dense<0.000000e+00> : vector<16xf32>
    %565 = vector.multi_reduction <add>, %564, %cst_179 [1] : vector<16x32xf32> to vector<16xf32>
    %566 = vector.shape_cast %565 : vector<16xf32> to vector<16x1xf32>
    %cst_180 = arith.constant 3.200000e+01 : f32
    %567 = vector.broadcast %cst_180 : f32 to vector<16x1xf32>
    %568 = arith.divf %566, %567 : vector<16x1xf32>
    %cst_181 = arith.constant 9.99999997E-7 : f32
    %569 = vector.broadcast %cst_181 : f32 to vector<16x1xf32>
    %570 = arith.addf %568, %569 : vector<16x1xf32>
    %571 = math.rsqrt %570 : vector<16x1xf32>
    %572 = vector.broadcast %571 : vector<16x1xf32> to vector<16x32xf32>
    %573 = arith.mulf %562, %572 : vector<16x32xf32>
    %574 = vector.broadcast %563 : vector<1x32xf32> to vector<16x32xf32>
    %575 = arith.mulf %573, %574 : vector<16x32xf32>
    %576 = arith.truncf %575 : vector<16x32xf32> to vector<16x32xbf16>
    %cst_182 = arith.constant dense<0.000000e+00> : vector<16x128xf32>
    %577 = tpu.matmul %576, %9, %cst_182 {dimension_numbers = #tpu.dot_dimension_numbers<[1], [0], [0], [1], [0, 0, 1, 1], [], []>} : vector<16x32xbf16>, vector<32x128xbf16>, vector<16x128xf32> -> vector<16x128xf32>
    %c0_183 = arith.constant 0 : index
    %c0_184 = arith.constant 0 : index
    %578 = vector.load %arg7[%c0_183, %c0_184] : memref<16x128xf32, #tpu.memory_space<vmem>>, vector<16x128xf32>
    tpu.vector_store %arg7[%c0_183, %c0_184], %577 {strides = array<i32>} : memref<16x128xf32, #tpu.memory_space<vmem>>, vector<16x128xf32>,
    return
  }
  func.func @transform_0(%arg0: i32, %arg1: memref<16xi32, #tpu.memory_space<smem>>, %arg2: memref<16xi32, #tpu.memory_space<smem>>) -> (i32, i32) {
    %c0_i32 = arith.constant 0 : i32
    %c0_i32_0 = arith.constant 0 : i32
    %c0_i32_1 = arith.constant 0 : i32
    return %c0_i32, %c0_i32_0 : i32, i32
  }
  func.func @transform_1(%arg0: i32, %arg1: memref<16xi32, #tpu.memory_space<smem>>, %arg2: memref<16xi32, #tpu.memory_space<smem>>) -> (i32, i32) {
    %c0_i32 = arith.constant 0 : i32
    %c0_i32_0 = arith.constant 0 : i32
    %c0_i32_1 = arith.constant 0 : i32
    return %c0_i32, %c0_i32_0 : i32, i32
  }
  func.func @transform_2(%arg0: i32, %arg1: memref<16xi32, #tpu.memory_space<smem>>, %arg2: memref<16xi32, #tpu.memory_space<smem>>) -> (i32, i32) {
    %c0_i32 = arith.constant 0 : i32
    %c0_i32_0 = arith.constant 0 : i32
    %c0_i32_1 = arith.constant 0 : i32
    return %c0_i32, %c0_i32_0 : i32, i32
  }
  func.func @transform_3(%arg0: i32, %arg1: memref<16xi32, #tpu.memory_space<smem>>, %arg2: memref<16xi32, #tpu.memory_space<smem>>) -> (i32, i32) {
    %c0_i32 = arith.constant 0 : i32
    %c0_i32_0 = arith.constant 0 : i32
    %c0_i32_1 = arith.constant 0 : i32
    return %c0_i32, %c0_i32_0 : i32, i32
  }
  func.func @transform_4(%arg0: i32, %arg1: memref<16xi32, #tpu.memory_space<smem>>, %arg2: memref<16xi32, #tpu.memory_space<smem>>) -> (i32, i32) {
    %c0_i32 = arith.constant 0 : i32
    %c0_i32_0 = arith.constant 0 : i32
    %c0_i32_1 = arith.constant 0 : i32
    return %c0_i32, %c0_i32_0 : i32, i32
  }
}

</mosaic_0001>

<bundles_post_ra>
// kernel: dual_t5_decoder_forward.1
= control target key start
LH: loop header
LB: loop body
LE: loop exit
PB: predicated region body
PF: predicated region fallthrough
CT: control target
= control target key end

     0   :  { %s3719_s0 = inlined_call_operand.vmem [shape: s32[16], index: 0, kind: input, shape index: {}]   ;;  %s3720_s2 = inlined_call_operand.vmem [shape: f32[128,32], index: 2, kind: input, shape index: {}]   ;;  %s3721_s3 = inlined_call_operand.hbm [shape: bf16[64,1024], index: 3, kind: input, shape index: {}]   ;;  %s3722_s4 = inlined_call_operand.vmem [shape: f32[4,32], index: 4, kind: input, shape index: {}]   ;;  %s3723_s5 = inlined_call_operand.vmem [shape: bf16[32,32], index: 5, kind: input, shape index: {}]   ;;  %s3724_s6 = inlined_call_operand.hbm [shape: f32[16,128], index: 6, kind: output, shape index: {}]   ;;  %s3725_s1 = inlined_call_operand.vmem [shape: s32[16], index: 1, kind: input, shape index: {}]  }
   0x1   :  { %s11_s23 = sshll.u32 %s3719_s0, 4  ;;  %s15_s26 = sshll.u32 %s3725_s1, 4  ;;  %s12_s23 = int_to_ptr.vmem [resolvable:$true] %s11_s23  ;;  %s16_s26 = int_to_ptr.vmem [resolvable:$true] %s15_s26 }
   0x2   :  { %s2932_s27 = scalar_lea.vmem %s12_s23, 16  ;;  %p2937_p1 = scmp.lt.s32.totalorder %s12_s23, %s12_s23 }
   0x3   :  { %p2933_p0 = scmp.ne.s32.totalorder %s12_s23, %s2932_s27  ;;  %p2938_p2 = scmp.lt.s32.totalorder %s2932_s27, %s2932_s27 }
   0x5   :  { %p2939_p3 = por %p2938_p2, %p2937_p1 }
   0x7   :  { %p2940_p4 = pnand %p2939_p3, %p2933_p0 }
   0x9   :  { %2943 = shalt.err (!%p2940_p4)  }
   0xa   :  { %s3006_s28 = smov [#allocation3]   ;;  %s2944_s29 = scalar_lea.vmem %s16_s26, 16 }
   0xb   :  { %14 = dma.vmem_to_smem %s12_s23, 16, %s3006_s28, [#allocation2] }
   0xc   :  { %p2945_p5 = scmp.ne.s32.totalorder %s16_s26, %s2944_s29  ;;  %p2949_p6 = scmp.lt.s32.totalorder %s16_s26, %s16_s26 }
   0xd   :  { %p2950_p7 = scmp.lt.s32.totalorder %s2944_s29, %s2944_s29 }
   0xf   :  { %p2951_p8 = por %p2950_p7, %p2949_p6 }
  0x11   :  { %p2952_p9 = pnand %p2951_p8, %p2945_p5 }
  0x13   :  { %2955 = shalt.err (!%p2952_p9)  }
  0x14   :  { %s3007_s0 = smov [#allocation4]  }
  0x15   :  { %18 = dma.vmem_to_smem %s16_s26, 16, %s3007_s0, [#allocation2] }
  0x16   :  { %3000 = dma.done.wait [#allocation2], 32 }
  0x17   :  { %3001 = vsyncadd [#allocation2], 4294967264 }
  0x18   :  { %20 = sfence }
  0x19   :  { %21 = vsyncpa [#allocation6], 0 }
  0x1a   :  { %22 = vsyncpa [#allocation7], 0  ;;  %s3008_s1 = smov [#allocation5]   ;;  %s2956_s9 = scalar_lea.hbm %s3721_s3, 4096 }
  0x1b   :  { %s30_s30 = sshll.u32 %s3008_s1, 4  ;;  %p2957_p10 = scmp.ne.s32.totalorder %s3721_s3, %s2956_s9  ;;  %s31_s30 = int_to_ptr.vmem [resolvable:$true] %s30_s30 }
  0x1c   :  { %p2960_p11 = scmp.lt.u32.totalorder %s2956_s9, %s3721_s3 }
  0x1e   :  { %p2962_p12 = pnand %p2960_p11, %p2957_p10 }
  0x20   :  { %2965 = shalt.err (!%p2962_p12)
}
  0x21   :  { %s2966_s14 = scalar_lea.vmem %s31_s30, 4096  ;;  %p2971_p0 = scmp.lt.s32.totalorder %s31_s30, %s31_s30 }
  0x22   :  { %p2967_p13 = scmp.ne.s32.totalorder %s31_s30, %s2966_s14  ;;  %p2972_p1 = scmp.lt.s32.totalorder %s2966_s14, %s2966_s14 }
  0x24   :  { %p2973_p2 = por %p2972_p1, %p2971_p0 }
  0x26   :  { %p2974_p3 = pnand %p2973_p2, %p2967_p13 }
  0x28   :  { %2977 = shalt.err (!%p2974_p3)
}
  0x29   :  { %s3009_s15 = smov 512   ;;  %s3010_s16 = smov 32  }
  0x2a   :  { %36 = dma.hbm_to_vmem [thread:$0]  %s3721_s3, 4096, %s31_s30, [#allocation6], %s3009_s15, %s3009_s15, %s3010_s16  }
  0x2b   :  { %3002 = dma.done.wait [#allocation6], 4096  }
  0x2c   :  { %3003 = vsyncadd [#allocation6], 4294963200  ;;  %v86_v0 = vlaneseq  ;;  %s93_s19 = sld [smem:[#allocation3]]  ;;  %s2376_s20 = sld [smem:[#allocation3 + $0x1]]  ;;  %v3011_v1 = vmov 0.0   ;;  %v235_v4 = vld [vmem:[%s3720_s2] sm:$0xff] }
  0x2d   :  { %2583 = vmatprep.subr.bf16.mxu1 %v3011_v1  ;;  %s3082_s21 = sld [smem:[#allocation3 + $0x2]]  ;;  %s3084_s22 = sld [smem:[#allocation3 + $0x3]]  ;;  %v236_v5 = vld [vmem:[%s3720_s2 + $0x8] sm:$0xff]  ;;  %v237_v6 = vld [vmem:[%s3720_s2 + $0x10] sm:$0xff]  ;;  %v238_v9 = vld [vmem:[%s3720_s2 + $0x18] sm:$0xff] }
  0x2e   :  { %s3086_s23 = sld [smem:[#allocation3 + $0x4]]  ;;  %v3088_v2 = vshrl.u32 %v86_v0, 7  ;;  %s3090_s24 = sld [smem:[#allocation3 + $0x5]]  ;;  %v3094_v3 = vand.u32 127, %v86_v0  ;;  %v2795_v8 = vpack.c.bf16 %v236_v5, %v235_v4  ;;  %v2799_v11 = vpack.c.bf16 %v238_v9, %v237_v6  ;;  %v239_v12 = vld [vmem:[%s3720_s2 + $0x20] sm:$0xff]  ;;  %v240_v13 = vld [vmem:[%s3720_s2 + $0x28] sm:$0xff] }
  0x2f   :  { %s3092_s25 = sld [smem:[#allocation3 + $0x6]]  ;;  %s3096_s3 = sld [smem:[#allocation3 + $0x7]]  ;;  %v241_v18 = vld [vmem:[%s3720_s2 + $0x30] sm:$0xff]  ;;  %v2803_v21 = vpack.c.bf16 %v240_v13, %v239_v12  ;;  %v242_v22 = vld [vmem:[%s3720_s2 + $0x38] sm:$0xff]  ;;  %v243_v40 = vld [vmem:[%s3720_s2 + $0x40] sm:$0xff] }
  0x30   :  { %s3098_s26 = sld [smem:[#allocation3 + $0x8]]  ;;  %s3109_s7 = sld [smem:[#allocation3 + $0x9]]  ;;  %vm91_vm0 = vcmp.eq.s32.totalorder %v3088_v2, 0  ;;  %vm100_vm1 = vcmp.eq.s32.totalorder %v3088_v2, 1  ;;  %vm109_vm3 = vcmp.eq.s32.totalorder %v3088_v2, 2  ;;  %2796 = vmatprep.subr.bf16.mxu0 %v2795_v8  ;;  %vm118_vm5 = vcmp.eq.s32.totalorder %v3088_v2, 3 }
  0x31   :  { %s3116_s10 = sld [smem:[#allocation3 + $0xa]]  ;;  %vm127_vm6 = vcmp.eq.s32.totalorder %v3088_v2, 4  ;;  %s3139_s15 = sld [smem:[#allocation3 + $0xb]]  ;;  %2798 = vmatpush3.bf16.msra.mxu0 %v2795_v8  ;;  %vm136_vm8 = vcmp.eq.s32.totalorder %v3088_v2, 5  ;;  %vm145_vm9 = vcmp.eq.s32.totalorder %v3088_v2, 6  ;;  %v3179_v28 = vadd.s32 8, %v3088_v2 }
  0x32   :  { %v94_v7 = vstv %s93_s19  ;;  %v103_v10 = vstv %s2376_s20  ;;  %2800 = vmatprep.subr.bf16.mxu0 %v2799_v11  ;;  %s3166_s20 = sld [smem:[#allocation3 + $0xc]]  ;;  %v2807_v36 = vpack.c.bf16 %v242_v22, %v241_v18  ;;  %v244_v41 = vld [vmem:[%s3720_s2 + $0x48] sm:$0xff]  ;;  %v245_v50 = vld [vmem:[%s3720_s2 + $0x50] sm:$0xff]  ;;  %s3276_s0 = sld [smem:[#allocation3 + $0xf]]  ;;  %v50_v18 = vld [vmem:[#allocation5] sm:$0xf] }
  0x33   :  { %vm3125_vm2 = vcmp.eq.s32.totalorder %v3094_v3, %v94_v7  ;;  %v112_v15 = vstv %s3082_s21  ;;  %vm3132_vm4 = vcmp.eq.s32.totalorder %v3094_v3, %v103_v10  ;;  %v121_v17 = vstv %s3084_s22  ;;  %s3213_s21 = sld [smem:[#allocation3 + $0xd]]  ;;  %v246_v51 = vld [vmem:[%s3720_s2 + $0x58] sm:$0xff]  ;;  %v247_v60 = vld [vmem:[%s3720_s2 + $0x60] sm:$0xff]  ;;  %s3013_s14 = smov 96  }
  0x34   :  { %vm3145_vm7 = vcmp.eq.s32.totalorder %v3094_v3, %v112_v15  ;;  %v130_v20 = vstv %s3086_s23  ;;  %vm96_vm10 = vmand %vm91_vm0, %vm3125_vm2  ;;  %vm3160_vm11 = vcmp.eq.s32.totalorder %v3094_v3, %v121_v17  ;;  %v139_v24 = vstv %s3090_s24  ;;  %v248_v61 = vld [vmem:[%s3720_s2 + $0x68] sm:$0xff]  ;;  %v249_v4 = vld [vmem:[%s3720_s2 + $0x70] sm:$0xff]  ;;  %s2391_s16 = sld [smem:[#allocation4 + $0x1]]  ;;  %s2392_s18 = sld [smem:[#allocation4 + $0x2]] }
  0x35   :  { %v148_v25 = vstv %s3092_s25  ;;  %v98_v26 = vsel %vm96_vm10, 1.0, %v3011_v1  ;;  %vm105_vm12 = vmand %vm100_vm1, %vm3132_vm4  ;;  %vm3174_vm13 = vcmp.eq.s32.totalorder %v3094_v3, %v130_v20  ;;  %vm3186_vm15 = vcmp.eq.s32.totalorder %v3094_v3, %v139_v24  ;;  %2802 = vmatpush3.bf16.msra.mxu0 %v2799_v11  ;;  %v250_v5 = vld [vmem:[%s3720_s2 + $0x78] sm:$0xff]  ;;  %v51_v19 = vld [vmem:[#allocation5 + $0x20] sm:$0xf]  ;;  %s2394_s25 = sld [smem:[#allocation4 + $0x4]]  ;;  %s2395_s28 = sld [smem:[#allocation4 + $0x5]] }
  0x36   :  { %v107_v29 = vsel %vm105_vm12, 1.0, %v98_v26  ;;  %vm114_vm14 = vmand %vm109_vm3, %vm3145_vm7  ;;  %v157_v31 = vstv %s3096_s3  ;;  %v166_v32 = vstv %s3098_s26  ;;  %vm3197_vm1 = vcmp.eq.s32.totalorder %v3094_v3, %v148_v25  ;;  %2804 = vmatprep.subr.bf16.mxu0 %v2803_v21  ;;  %s3252_s3 = sld [smem:[#allocation3 + $0xe]]  ;;  %v52_v20 = vld [vmem:[#allocation5 + $0x40] sm:$0xf]  ;;  %s2398_s13 = sld [smem:[#allocation4 + $0x8]] }
  0x37   :  { %v116_v33 = vsel %vm114_vm14, 1.0, %v107_v29  ;;  %vm123_vm0 = vmand %vm118_vm5, %vm3160_vm11  ;;  %vm154_vm2 = vcmp.eq.s32.totalorder %v3088_v2, 7  ;;  %v175_v35 = vstv %s3109_s7  ;;  %vm3208_vm4 = vcmp.eq.s32.totalorder %v3094_v3, %v157_v31  ;;  %v53_v22 = vld [vmem:[#allocation5 + $0x60] sm:$0xf]  ;;  %s2396_s30 = sld [smem:[#allocation4 + $0x6]] }
  0x38   :  { %v125_v37 = vsel %vm123_vm0, 1.0, %v116_v33  ;;  %vm132_vm3 = vmand %vm127_vm6, %vm3174_vm13  ;;  %v184_v39 = vstv %s3116_s10  ;;  %vm164_vm6 = vcmp.eq.s32.totalorder %v3179_v28, 8  ;;  %vm3227_vm7 = vcmp.eq.s32.totalorder %v3094_v3, %v166_v32  ;;  %v3328_v33 = vld [vmem:[%s3722_s4] sm:$0xf]  ;;  %s2397_s10 = sld [smem:[#allocation4 + $0x7]] }
  0x39   :  { %v134_v42 = vsel %vm132_vm3, 1.0, %v125_v37  ;;  %vm141_vm5 = vmand %vm136_vm8, %vm3186_vm15  ;;  %vm173_vm11 = vcmp.eq.s32.totalorder %v3179_v28, 9  ;;  %vm3237_vm12 = vcmp.eq.s32.totalorder %v3094_v3, %v175_v35  ;;  %v193_v46 = vstv %s3139_s15  ;;  %2806 = vmatpush3.bf16.msra.mxu0 %v2803_v21  ;;  %s340_s15 = sld [smem:[#allocation4]] }
  0x3a   :  { %v143_v44 = vsel %vm141_vm5, 1.0, %v134_v42  ;;  %vm150_vm10 = vmand %vm145_vm9, %vm3197_vm1  ;;  %vm182_vm13 = vcmp.eq.s32.totalorder %v3179_v28, 10  ;;  %vm3248_vm9 = vcmp.eq.s32.totalorder %v3094_v3, %v184_v39  ;;  %2808 = vmatprep.subr.bf16.mxu0 %v2807_v36  ;;  %v2811_v49 = vpack.c.bf16 %v244_v41, %v243_v40  ;;  %s359_s24 = ssub.s32 1, %s2392_s18  ;;  %s2399_s18 = sld [smem:[#allocation4 + $0x9]] }
  0x3b   :  { %v152_v47 = vsel %vm150_vm10, 1.0, %v143_v44  ;;  %vm159_vm8 = vmand %vm154_vm2, %vm3208_vm4  ;;  %vm191_vm0 = vcmp.eq.s32.totalorder %v3179_v28, 11  ;;  %vm194_vm1 = vcmp.eq.s32.totalorder %v3094_v3, %v193_v46  ;;  %v202_v54 = vstv %s3166_s20  ;;  %s350_s20 = ssub.s32 1, %s2391_s16  ;;  %s360_s26 = scvt.s32.f32 %s359_s24 }
  0x3c   :  { %v161_v52 = vsel %vm159_vm8, 1.0, %v152_v47  ;;  %vm169_vm14 = vmand %vm164_vm6, %vm3227_vm7  ;;  %v2815_v56 = vpack.c.bf16 %v246_v51, %v245_v50  ;;  %vm200_vm4 = vcmp.eq.s32.totalorder %v3179_v28, 12  ;;  %vm203_vm5 = vcmp.eq.s32.totalorder %v3094_v3, %v202_v54  ;;  %s351_s23 = scvt.s32.f32 %s350_s20  ;;  %s377_s1 = ssub.s32 1, %s2394_s25 }
  0x3d   :  { %2580 = vmatprep.mubr.f32.mxu0 %v161_v52  ;;  %v171_v53 = vsel %vm169_vm14, 1.0, %v3011_v1  ;;  %vm178_vm15 = vmand %vm173_vm11, %vm3237_vm12  ;;  %2810 = vmatpush3.bf16.msra.mxu0 %v2807_v36  ;;  %v211_v59 = vstv %s3213_s21  ;;  %vm209_vm7 = vcmp.eq.s32.totalorder %v3179_v28, 13  ;;  %v220_v63 = vstv %s3252_s3  ;;  %s2393_s21 = sld [smem:[#allocation4 + $0x3]]  ;;  %s361_s29 = smul.f32 -1e+09, %s360_s26 }
  0x3e   :  { %v180_v55 = vsel %vm178_vm15, 1.0, %v171_v53  ;;  %vm187_vm2 = vmand %vm182_vm13, %vm3248_vm9  ;;  %2812 = vmatprep.subr.bf16.mxu0 %v2811_v49  ;;  %vm212_vm10 = vcmp.eq.s32.totalorder %v3094_v3, %v211_v59  ;;  %v2819_v0 = vpack.c.bf16 %v248_v61, %v247_v60  ;;  %vm218_vm12 = vcmp.eq.s32.totalorder %v3179_v28, 14  ;;  %s352_s3 = smul.f32 -1e+09, %s351_s23  ;;  %s378_s8 = scvt.s32.f32 %s377_s1 }
  0x3f   :  { %v189_v57 = vsel %vm187_vm2, 1.0, %v180_v55  ;;  %vm3278_vm3 = vmand %vm191_vm0, %vm194_vm1  ;;  %vm221_vm8 = vcmp.eq.s32.totalorder %v3094_v3, %v220_v63  ;;  %v229_v7 = vstv %s3276_s0  ;;  %v2823_v8 = vpack.c.bf16 %v250_v5, %v249_v4  ;;  %s341_s17 = ssub.s32 1, %s340_s15  ;;  %s386_s9 = ssub.s32 1, %s2395_s28 }
  0x40   :  { %v198_v62 = vsel %vm3278_vm3, 1.0, %v189_v57  ;;  %vm205_vm6 = vmand %vm200_vm4, %vm203_vm5  ;;  %vm227_vm9 = vcmp.eq.s32.totalorder %v3179_v28, 15  ;;  %vm230_vm14 = vcmp.eq.s32.totalorder %v3094_v3, %v229_v7  ;;  %vm491_vm0 = vcmask 261120   ;;  %s342_s19 = scvt.s32.f32 %s341_s17  ;;  %s379_s11 = smul.f32 -1e+09, %s378_s8 }
  0x41   :  { %2814 = vmatpush3.bf16.msra.mxu0 %v2811_v49  ;;  %v207_v6 = vsel %vm205_vm6, 1.0, %v198_v62  ;;  %vm214_vm11 = vmand %vm209_vm7, %vm212_vm10  ;;  %v2406_v21 = vcombine.low %v50_v18, %v51_v19  ;;  %vm3012_vm1 = vmmov 0   ;;  %v2407_v23 = vcombine.low %v52_v20, %v53_v22  ;;  %s387_s12 = scvt.s32.f32 %s386_s9  ;;  %s395_s2 = ssub.s32 1, %s2396_s30 }
  0x42   :  { %2816 = vmatprep.subr.bf16.mxu0 %v2815_v56  ;;  %v216_v9 = vsel %vm214_vm11, 1.0, %v207_v6  ;;  %vm223_vm13 = vmand %vm218_vm12, %vm221_vm8  ;;  %2587 = vmatprep.mubr.msk.bf16.mxu1 %vm3012_vm1, %v3011_v1  ;;  %v509_v31 = vsub.s32 0, %v3088_v2  ;;  %vm574_vm2 = vcmask 64512   ;;  %v326_v48 = vshra.s32 %v3088_v2, 3  ;;  %s343_s22 = smul.f32 -1e+09, %s342_s19  ;;  %s396_s16 = scvt.s32.f32 %s395_s2 }
  0x43   :  { %v225_v10 = vsel %vm223_vm13, 1.0, %v216_v9  ;;  %vm232_vm15 = vmand %vm227_vm9, %vm230_vm14  ;;  %2584 = vmatpush3.bf16.msra.mxu1 %v2406_v21  ;;  %v328_v49 = vshra.s32 %v3094_v3, 3  ;;  %v331_v50 = vand.u32 7, %v3088_v2  ;;  %v333_v51 = vand.u32 7, %v3094_v3  ;;  %s368_s27 = ssub.s32 1, %s2393_s21  ;;  %s404_s17 = ssub.s32 1, %s2397_s10 }
  0x44   :  { %v234_v11 = vsel %vm232_vm15, 1.0, %v225_v10  ;;  %2585 = vmatprep.subr.bf16.mxu1 %v3011_v1  ;;  %v510_v35 = vrot.slane %v3328_v33, %v509_v31  ;;  %v327_v52 = vshra.s32 %v3179_v28, 3  ;;  %v332_v53 = vand.u32 7, %v3179_v28  ;;  %s369_s0 = scvt.s32.f32 %s368_s27  ;;  %s388_s15 = smul.f32 -1e+09, %s387_s12 }
  0x45   :  { %2818 = vmatpush3.bf16.msra.mxu0 %v2815_v56  ;;  %vm3354_vm3 = vcmp.eq.s32.totalorder %v326_v48, %v328_v49  ;;  %vm334_vm4 = vcmp.ge.s32.totalorder %v331_v50, %v333_v51  ;;  %vm344_vm10 = vcmp.eq.s32.totalorder %v3094_v3, 0  ;;  %v345_v57 = vstv %s343_s22  ;;  %s397_s19 = smul.f32 -1e+09, %s396_s16  ;;  %s405_s20 = scvt.s32.f32 %s404_s17 }
  0x46   :  { %2820 = vmatprep.subr.bf16.mxu0 %v2819_v0  ;;  %vm3360_vm5 = vcmp.eq.s32.totalorder %v327_v52, %v328_v49  ;;  %vm3364_vm6 = vcmp.ge.s32.totalorder %v332_v53, %v333_v51  ;;  %vm336_vm7 = vmand %vm3354_vm3, %vm334_vm4  ;;  %v3014_v58 = vmov -1e+09   ;;  %v346_v60 = vsel %vm344_vm10, %v345_v57, 0.0  ;;  %s370_s7 = smul.f32 -1e+09, %s369_s0  ;;  %s413_s21 = ssub.s32 1, %s2398_s13 }
  0x47   :  { %2586 = vmatpush3.bf16.msra.mxu1 %v2407_v23  ;;  %vm337_vm11 = vmand %vm3360_vm5, %vm3364_vm6  ;;  %v338_v59 = vsel %vm336_vm7, 0.0, %v3014_v58  ;;  %vm353_vm12 = vcmp.eq.s32.totalorder %v3094_v3, 1  ;;  %v354_v61 = vstv %s352_s3  ;;  %vm362_vm8 = vcmp.eq.s32.totalorder %v3094_v3, 2  ;;  %s2400_s22 = sld [smem:[#allocation4 + $0xa]]  ;;  %s406_s23 = smul.f32 -1e+09, %s405_s20 }
  0x48   :  { %2591 = vmatprep.subr.bf16.mxu1 %v3011_v1  ;;  %v339_v62 = vsel %vm337_vm11, 0.0, %v3014_v58  ;;  %v347_v63 = vadd.f32 %v346_v60, %v338_v59  ;;  %v363_v4 = vstv %s361_s29  ;;  %vm371_vm13 = vcmp.eq.s32.totalorder %v3094_v3, 3  ;;  %s414_s24 = scvt.s32.f32 %s413_s21  ;;  %s422_s25 = ssub.s32 1, %s2399_s18 }
  0x49   :  { %2822 = vmatpush3.bf16.msra.mxu0 %v2819_v0  ;;  %v355_v0 = vsel %vm353_vm12, %v354_v61, 0.0  ;;  %v348_v5 = vadd.f32 %v346_v60, %v339_v62  ;;  %v364_v7 = vsel %vm362_vm8, %v363_v4, 0.0  ;;  %vm380_vm9 = vcmp.eq.s32.totalorder %v3094_v3, 4  ;;  %s2401_s3 = sld [smem:[#allocation4 + $0xb]]  ;;  %s423_s27 = scvt.s32.f32 %s422_s25 }
  0x4a   :  { %2824 = vmatprep.subr.bf16.mxu0 %v2823_v8  ;;  %v356_v6 = vadd.f32 %v355_v0, %v347_v63  ;;  %vm389_vm14 = vcmp.eq.s32.totalorder %v3094_v3, 5  ;;  %v390_v18 = vstv %s388_s15  ;;  %vm398_vm15 = vcmp.eq.s32.totalorder %v3094_v3, 6  ;;  %s415_s26 = smul.f32 -1e+09, %s414_s24  ;;  %s2402_s29 = sld [smem:[#allocation4 + $0xc]] }
  0x4b   :  { %v357_v9 = vadd.f32 %v355_v0, %v348_v5  ;;  %v391_v21 = vsel %vm389_vm14, %v390_v18, 0.0  ;;  %v399_v22 = vstv %s397_s19  ;;  %vm407_vm3 = vcmp.eq.s32.totalorder %v3094_v3, 7  ;;  %s424_s0 = smul.f32 -1e+09, %s423_s27  ;;  %s2405_s15 = sld [smem:[#allocation4 + $0xf]] }
  0x4c   :  { %v365_v10 = vadd.f32 %v364_v7, %v356_v6  ;;  %vm416_vm4 = vcmp.eq.s32.totalorder %v3094_v3, 8  ;;  %v417_v31 = vstv %s415_s26  ;;  %vm425_vm5 = vcmp.eq.s32.totalorder %v3094_v3, 9  ;;  %s3015_s25 = smov 88   ;;  %s3017_s26 = smov 120  }
  0x4d   :  { %2826 = vmatpush3.bf16.msra.mxu0 %v2823_v8  ;;  %v372_v8 = vstv %s370_s7  ;;  %s431_s28 = ssub.s32 1, %s2400_s22  ;;  %s2403_s7 = sld [smem:[#allocation4 + $0xd]]  ;;  %vm434_vm6 = vcmp.eq.s32.totalorder %v3094_v3, 10  ;;  %vm443_vm7 = vcmp.eq.s32.totalorder %v3094_v3, 11  ;;  %vm452_vm10 = vcmp.eq.s32.totalorder %v3094_v3, 12 }
  0x4e   :  { %2609 = vmatprep.subr.bf16.mxu0 %v3011_v1  ;;  %s432_s1 = scvt.s32.f32 %s431_s28  ;;  %vm461_vm11 = vcmp.eq.s32.totalorder %v3094_v3, 13  ;;  %vm470_vm12 = vcmp.eq.s32.totalorder %v3094_v3, 14  ;;  %vm479_vm8 = vcmp.eq.s32.totalorder %v3094_v3, 15  ;;  %s3018_s27 = smov 80  }
  0x4f   :  { %s440_s30 = ssub.s32 1, %s2401_s3  ;;  %s3016_s3 = smov 64  }
  0x50   :  { %2581 = vmatmul.mubr.f32.vlgmr.msra.gmra.mrb[0].mxu0 %v234_v11  ;;  %v373_v11 = vsel %vm371_vm13, %v372_v8, 0.0  ;;  %s433_s8 = smul.f32 -1e+09, %s432_s1  ;;  %s441_s9 = scvt.s32.f32 %s440_s30  ;;  %vm622_vm13 = vcmask 130048  }
  0x51   :  { %2611 = vmatprep.mubr.msk.bf16.mxu0 %vm3012_vm1, %v3011_v1  ;;  %s449_s10 = ssub.s32 1, %s2402_s29  ;;  %s476_s21 = ssub.s32 1, %s2405_s15 }
  0x52   :  { %s442_s12 = smul.f32 -1e+09, %s441_s9  ;;  %s450_s2 = scvt.s32.f32 %s449_s10 }
  0x53   :  { %s458_s13 = ssub.s32 1, %s2403_s7  ;;  %s3019_s28 = smov 56  }
  0x54   :  { %s451_s16 = smul.f32 -1e+09, %s450_s2  ;;  %s459_s17 = scvt.s32.f32 %s458_s13 }
  0x55   :  { %s3020_s29 = smov 112   ;;  %s3022_s1 = smov 104  }
  0x56   :  { %v453_v50 = vstv %s451_s16  ;;  %s460_s19 = smul.f32 -1e+09, %s459_s17  ;;  %s3023_s30 = smov 72  }
  0x57   :  { %v454_v54 = vsel %vm452_vm10, %v453_v50, 0.0  ;;  %s3024_s7 = smov 40  }
  0x58   :  { %v462_v55 = vstv %s460_s19 }
  0x59   :  { %v463_v59 = vsel %vm461_vm11, %v462_v55, 0.0 }
 0x123   :  { %v3308_v12 = vpop.f32.mrb[0].mxu0 }
 0x124   :  { %v3310_v13 = vpop.f32.mrb[1].mxu0  ;;  %v490_v16 = vmul.f32 %v3308_v12, %v3308_v12 }
 0x125   :  { %v489_v14 = vmul.f32 %v3310_v13, %v3310_v13 }
 0x126   :  { %v495_v17 = vsel %vm491_vm0, %v490_v16, 0.0  ;;  %v374_v16 = vadd.f32 %v373_v11, %v365_v10 }
 0x127   :  { %v492_v15 = vsel %vm491_vm0, %v489_v14, 0.0  ;;  %v381_v14 = vstv %s379_s11  ;;  %s2404_s11 = sld [smem:[#allocation4 + $0xe]] }
 0x128   :  { %493 = vadd.xlane.f32.xlu0 %v492_v15  ;;  %v366_v15 = vadd.f32 %v364_v7, %v357_v9 }
 0x12a   :  { %v375_v19 = vadd.f32 %v373_v11, %v366_v15 }
 0x12c   :  { %496 = vadd.xlane.f32.xlu0 %v495_v17  ;;  %v382_v17 = vsel %vm380_vm9, %v381_v14, 0.0  ;;  %vm819_vm9 = vcmask 1043456  }
 0x12d   :  { %v383_v20 = vadd.f32 %v382_v17, %v374_v16  ;;  %v384_v23 = vadd.f32 %v382_v17, %v375_v19  ;;  %s467_s18 = ssub.s32 1, %s2404_s11 }
 0x12e   :  { %s468_s20 = scvt.s32.f32 %s467_s18 }
 0x130   :  { %s469_s22 = smul.f32 -1e+09, %s468_s20 }
 0x132   :  { %v471_v60 = vstv %s469_s22 }
 0x133   :  { %v472_v63 = vsel %vm470_vm12, %v471_v60, 0.0 }
 0x1b5   :  { %v494_v24 = vpop.xlane.xlu0 %493 }
 0x1b6   :  { %v499_v25 = vmul.f32 0.03125, %v494_v24  ;;  %v392_v24 = vadd.f32 %v391_v21, %v383_v20 }
 0x1b8   :  { %v501_v26 = vadd.f32 1e-06, %v499_v25  ;;  %v400_v25 = vsel %vm398_vm15, %v399_v22, 0.0 }
 0x1b9   :  { %v497_v27 = vpop.xlane.xlu0 %496 }
 0x1ba   :  { %2851 = vrsqrt.f32 %v501_v26  ;;  %v500_v29 = vmul.f32 0.03125, %v497_v27  ;;  %v408_v26 = vstv %s406_s23  ;;  %v393_v27 = vadd.f32 %v391_v21, %v384_v23  ;;  %s477_s23 = scvt.s32.f32 %s476_s21 }
 0x1bc   :  { %v502_v30 = vadd.f32 1e-06, %v500_v29  ;;  %v401_v29 = vadd.f32 %v400_v25, %v392_v24  ;;  %s478_s24 = smul.f32 -1e+09, %s477_s23 }
 0x1be   :  { %2853 = vrsqrt.f32 %v502_v30  ;;  %v409_v30 = vsel %vm407_vm3, %v408_v26, 0.0  ;;  %v480_v0 = vstv %s478_s24 }
 0x1bf   :  { %v481_v6 = vsel %vm479_vm8, %v480_v0, 0.0 }
 0x1c4   :  { %v2852_v32 = vpop.eup %2851 }
 0x1c5   :  { %v505_v34 = vmul.f32 %v2852_v32, %v3310_v13  ;;  %v402_v32 = vadd.f32 %v400_v25, %v393_v27 }
 0x1c7   :  { %v511_v38 = vmul.f32 %v510_v35, %v505_v34  ;;  %v410_v34 = vadd.f32 %v409_v30, %v401_v29 }
 0x1c8   :  { %v2854_v36 = vpop.eup %2853 }
 0x1c9   :  { %v506_v37 = vmul.f32 %v2854_v36, %v3308_v12  ;;  %v426_v36 = vstv %s424_s0  ;;  %s3021_s0 = smov 48  }
 0x1cb   :  { %v512_v39 = vmul.f32 %v510_v35, %v506_v37  ;;  %v418_v35 = vsel %vm416_vm4, %v417_v31, 0.0  ;;  %v411_v37 = vadd.f32 %v409_v30, %v402_v32 }
 0x1cd   :  { %v513_v40 = vpack.c.bf16 %v512_v39, %v511_v38  ;;  %v419_v38 = vadd.f32 %v418_v35, %v410_v34  ;;  %v427_v39 = vsel %vm425_vm5, %v426_v36, 0.0 }
 0x1cf   :  { %2588 = vmatmul.mubr.msk.bf16.vlgmr.msra.gmra.mrb[0].mxu1 %vm491_vm0, %v513_v40  ;;  %v435_v40 = vstv %s433_s8 }
 0x1d0   :  { %2593 = vmatprep.mubr.msk.bf16.mxu1 %vm3012_vm1, %v3011_v1 }
 0x2a2   :  { %v563_v41 = vpop.f32.mrb[0].mxu1 }
 0x2a3   :  { %v2589_v42 = vpop.f32.mrb[1].mxu1 }
 0x2a4   :  { %v566_v43 = vpop.f32.mrb[2].mxu1  ;;  %v428_v42 = vadd.f32 %v427_v39, %v419_v38 }
 0x2a5   :  { %v3336_v44 = vpack.c.bf16 %v566_v43, %v563_v41  ;;  %v2590_v45 = vpop.f32.mrb[3].mxu1  ;;  %v420_v41 = vadd.f32 %v418_v35, %v411_v37  ;;  %v436_v43 = vsel %vm434_vm6, %v435_v40, 0.0 }
 0x2a6   :  { %v444_v45 = vstv %s442_s12 }
 0x2a7   :  { %572 = vrot.lane.b32.xlu1 %v3336_v44, %s3013_s14  ;;  %v445_v49 = vsel %vm443_vm7, %v444_v45, 0.0 }
 0x319   :  { %v573_v46 = vpop.permute.xlu1 %572 }
 0x31a   :  { %v579_v47 = vsel %vm574_vm2, %v573_v46, 0  ;;  %v429_v46 = vadd.f32 %v427_v39, %v420_v41 }
 0x31b   :  { %2592 = vmatpush3.bf16.xpose.msra.mxu1 %v579_v47  ;;  %v437_v47 = vadd.f32 %v436_v43, %v428_v42 }
 0x31c   :  { %2597 = vmatprep.subr.bf16.mxu1 %v3011_v1  ;;  %v438_v51 = vadd.f32 %v436_v43, %v429_v46 }
 0x31d   :  { %v446_v53 = vadd.f32 %v445_v49, %v437_v47 }
 0x31e   :  { %v447_v56 = vadd.f32 %v445_v49, %v438_v51 }
 0x31f   :  { %v455_v57 = vadd.f32 %v454_v54, %v446_v53 }
 0x320   :  { %v456_v61 = vadd.f32 %v454_v54, %v447_v56 }
 0x321   :  { %v464_v62 = vadd.f32 %v463_v59, %v455_v57 }
 0x322   :  { %2594 = vmatmul.mubr.msk.bf16.vlgmr.msra.gmra.mrb[4].mxu1 %vm574_vm2, %v3336_v44  ;;  %v465_v4 = vadd.f32 %v463_v59, %v456_v61 }
 0x323   :  { %2599 = vmatprep.mubr.msk.bf16.mxu1 %vm3012_vm1, %v3011_v1  ;;  %v473_v5 = vadd.f32 %v472_v63, %v464_v62 }
 0x324   :  { %v474_v7 = vadd.f32 %v472_v63, %v465_v4 }
 0x325   :  { %v3392_v8 = vadd.f32 %v481_v6, %v473_v5 }
 0x326   :  { %v3394_v9 = vadd.f32 %v481_v6, %v474_v7 }
 0x3f5   :  { %v615_v10 = vpop.f32.mrb[4].mxu1 }
 0x3f6   :  { %v616_v11 = vadd.f32 %v615_v10, %v3392_v8  ;;  %v2595_v14 = vpop.f32.mrb[5].mxu1 }
 0x3f7   :  { %v618_v15 = vpop.f32.mrb[6].mxu1 }
 0x3f8   :  { %v619_v16 = vadd.f32 %v618_v15, %v3394_v9  ;;  %v2596_v17 = vpop.f32.mrb[7].mxu1  ;;  %v623_v18 = vsel %vm622_vm13, %v616_v11, -inf }
 0x3f9   :  { %624 = vmax.xlane.f32.xlu1 %v623_v18 }
 0x3fa   :  { %v626_v19 = vsel %vm622_vm13, %v619_v16, -inf }
 0x3fb   :  { %627 = vmax.xlane.f32.xlu0 %v626_v19 }
 0x40a   :  { %696 = vrot.lane.b32.xlu1 %v3336_v44, %s3015_s25 }
 0x486   :  { %v625_v20 = vpop.xlane.xlu1 %624 }
 0x487   :  { %v629_v21 = vsub.f32 %v616_v11, %v625_v20  ;;  %v55_v11 = vld [vmem:[#allocation5 + $0x24] sm:$0xf] }
 0x488   :  { %v628_v22 = vpop.xlane.xlu0 %627  ;;  %v821_v14 = vsel %vm819_vm9, %v55_v11, 0  ;;  %v54_v20 = vld [vmem:[#allocation5 + $0x4] sm:$0xf] }
 0x489   :  { %v631_v23 = vmul.f32 1.442695, %v629_v21  ;;  %v630_v24 = vsub.f32 %v619_v16, %v628_v22 }
 0x48a   :  { %v697_v39 = vpop.permute.xlu1 %696 }
 0x48b   :  { %2855 = vpow2.f32 %v631_v23  ;;  %v633_v25 = vmul.f32 1.442695, %v630_v24  ;;  %v702_v41 = vsel %vm574_vm2, %v697_v39, 0  ;;  %v868_v24 = vsel %vm819_vm9, %v54_v20, 0 }
 0x48d   :  { %2857 = vpow2.f32 %v633_v25 }
 0x495   :  { %v2856_v26 = vpop.eup %2855 }
 0x496   :  { %v635_v27 = vsel %vm622_vm13, %v2856_v26, 0.0 }
 0x497   :  { %v2858_v29 = vpop.eup %2857  ;;  %636 = vadd.xlane.f32.xlu0 %v635_v27 }
 0x498   :  { %v638_v30 = vsel %vm622_vm13, %v2858_v29, 0.0 }
 0x49b   :  { %639 = vadd.xlane.f32.xlu0 %v638_v30 }
 0x4b1   :  { %646 = vrot.lane.b32.xlu0 %v3336_v44, %s3016_s3 }
 0x4b5   :  { %694 = vrot.lane.b32.xlu0 %v3336_v44, %s3017_s26 }
 0x524   :  { %v637_v31 = vpop.xlane.xlu0 %636 }
 0x525   :  { %2859 = vrcp.f32 %v637_v31 }
 0x528   :  { %v640_v32 = vpop.xlane.xlu0 %639 }
 0x529   :  { %2861 = vrcp.f32 %v640_v32 }
 0x52c   :  { %v647_v34 = vpop.permute.xlu0 %646 }
 0x52d   :  { %2598 = vmatpush3.bf16.msra.mxu1 %v647_v34 }
 0x52e   :  { %2603 = vmatprep.subr.bf16.mxu1 %v3011_v1 }
 0x52f   :  { %v2860_v35 = vpop.eup %2859 }
 0x530   :  { %v643_v37 = vmul.f32 %v2860_v35, %v2856_v26  ;;  %v695_v42 = vpop.permute.xlu0 %694 }
 0x533   :  { %v2862_v36 = vpop.eup %2861 }
 0x534   :  { %v644_v38 = vmul.f32 %v2862_v36, %v2858_v29 }
 0x536   :  { %v645_v40 = vpack.c.bf16 %v644_v38, %v643_v37 }
 0x538   :  { %2600 = vmatmul.mubr.msk.bf16.vlgmr.msra.gmra.mrb[8].mxu1 %vm622_vm13, %v645_v40 }
 0x539   :  { %2604 = vmatpush3.bf16.xpose.msra.mxu1 %v702_v41  ;;  %2605 = vmatprep.mubr.msk.bf16.mxu1 %vm3012_vm1, %v3011_v1 }
 0x53a   :  { %2615 = vmatprep.subr.bf16.mxu1 %v3011_v1 }
 0x540   :  { %2606 = vmatmul.mubr.msk.bf16.vlgmr.msra.gmra.mrb[12].mxu1 %vm574_vm2, %v695_v42 }
 0x541   :  { %2617 = vmatprep.mubr.msk.bf16.mxu1 %vm3012_vm1, %v3011_v1  ;;  %2616 = vmatpush3.bf16.msra.mxu1 %v821_v14 }
 0x542   :  { %2627 = vmatprep.subr.bf16.mxu1 %v3011_v1 }
 0x60b   :  { %v686_v43 = vpop.f32.mrb[8].mxu1 }
 0x60c   :  { %v2601_v45 = vpop.f32.mrb[9].mxu1 }
 0x60d   :  { %v689_v46 = vpop.f32.mrb[10].mxu1 }
 0x60e   :  { %v693_v47 = vpack.c.bf16 %v689_v46, %v686_v43  ;;  %v2602_v49 = vpop.f32.mrb[11].mxu1 }
 0x613   :  { %v738_v50 = vpop.f32.mrb[12].mxu1 }
 0x614   :  { %v739_v51 = vadd.f32 %v738_v50, %v3392_v8  ;;  %v2607_v53 = vpop.f32.mrb[13].mxu1 }
 0x615   :  { %v741_v54 = vpop.f32.mrb[14].mxu1 }
 0x616   :  { %v742_v55 = vadd.f32 %v741_v54, %v3394_v9  ;;  %v2608_v56 = vpop.f32.mrb[15].mxu1  ;;  %v745_v57 = vsel %vm622_vm13, %v739_v51, -inf }
 0x617   :  { %746 = vmax.xlane.f32.xlu0 %v745_v57 }
 0x618   :  { %v748_v59 = vsel %vm622_vm13, %v742_v55, -inf }
 0x619   :  { %749 = vmax.xlane.f32.xlu1 %v748_v59 }
 0x62a   :  { %913 = vrot.lane.b32.xlu1 %v3336_v44, %s3018_s27 }
 0x6a4   :  { %v747_v60 = vpop.xlane.xlu0 %746 }
 0x6a5   :  { %v751_v61 = vsub.f32 %v739_v51, %v747_v60 }
 0x6a6   :  { %v750_v62 = vpop.xlane.xlu1 %749 }
 0x6a7   :  { %v753_v63 = vmul.f32 1.442695, %v751_v61  ;;  %v752_v0 = vsub.f32 %v742_v55, %v750_v62 }
 0x6a9   :  { %2863 = vpow2.f32 %v753_v63  ;;  %v755_v4 = vmul.f32 1.442695, %v752_v0 }
 0x6aa   :  { %v914_v27 = vpop.permute.xlu1 %913 }
 0x6ab   :  { %2865 = vpow2.f32 %v755_v4  ;;  %v919_v32 = vsel %vm574_vm2, %v914_v27, 0 }
 0x6b3   :  { %v2864_v5 = vpop.eup %2863 }
 0x6b4   :  { %v757_v6 = vsel %vm622_vm13, %v2864_v5, 0.0 }
 0x6b5   :  { %v2866_v7 = vpop.eup %2865  ;;  %758 = vadd.xlane.f32.xlu0 %v757_v6 }
 0x6b6   :  { %v760_v10 = vsel %vm622_vm13, %v2866_v7, 0.0 }
 0x6b9   :  { %761 = vadd.xlane.f32.xlu0 %v760_v10 }
 0x6cf   :  { %768 = vrot.lane.b32.xlu0 %v3336_v44, %s3019_s28 }
 0x6d3   :  { %911 = vrot.lane.b32.xlu0 %v3336_v44, %s3020_s29 }
 0x742   :  { %v759_v15 = vpop.xlane.xlu0 %758 }
 0x743   :  { %2867 = vrcp.f32 %v759_v15 }
 0x746   :  { %v762_v16 = vpop.xlane.xlu0 %761 }
 0x747   :  { %2869 = vrcp.f32 %v762_v16 }
 0x74a   :  { %v769_v17 = vpop.permute.xlu0 %768 }
 0x74b   :  { %2610 = vmatpush3.bf16.msra.mxu0 %v769_v17 }
 0x74c   :  { %2621 = vmatprep.subr.bf16.mxu0 %v3011_v1 }
 0x74d   :  { %v2868_v18 = vpop.eup %2867 }
 0x74e   :  { %v765_v21 = vmul.f32 %v2868_v18, %v2864_v5  ;;  %v912_v38 = vpop.permute.xlu0 %911 }
 0x751   :  { %v2870_v19 = vpop.eup %2869 }
 0x752   :  { %v766_v22 = vmul.f32 %v2870_v19, %v2866_v7 }
 0x754   :  { %v767_v23 = vpack.c.bf16 %v766_v22, %v765_v21  ;;  %v56_v21 = vld [vmem:[#allocation5 + $0x44] sm:$0xf] }
 0x755   :  { %v1037_v22 = vsel %vm819_vm9, %v56_v21, 0 }
 0x756   :  { %2612 = vmatmul.mubr.msk.bf16.vlgmr.msra.gmra.mrb[4].mxu0 %vm622_vm13, %v767_v23 }
 0x757   :  { %2622 = vmatpush3.bf16.msra.mxu0 %v868_v24  ;;  %2623 = vmatprep.mubr.msk.bf16.mxu0 %vm3012_vm1, %v3011_v1 }
 0x758   :  { %2633 = vmatprep.subr.bf16.mxu0 %v3011_v1 }
 0x75e   :  { %2624 = vmatmul.mubr.msk.bf16.vlgmr.msra.gmra.mrb[8].mxu0 %vm574_vm2, %v693_v47 }
 0x75f   :  { %2635 = vmatprep.mubr.msk.bf16.mxu0 %vm3012_vm1, %v3011_v1 }
 0x829   :  { %v808_v25 = vpop.f32.mrb[4].mxu0 }
 0x82a   :  { %v2613_v26 = vpop.f32.mrb[5].mxu0 }
 0x82b   :  { %v811_v29 = vpop.f32.mrb[6].mxu0 }
 0x82c   :  { %v815_v30 = vpack.c.bf16 %v811_v29, %v808_v25  ;;  %v2614_v31 = vpop.f32.mrb[7].mxu0 }
 0x82e   :  { %2618 = vmatmul.mubr.msk.bf16.vlgmr.msra.gmra.mrb[16].mxu1 %vm574_vm2, %v815_v30 }
 0x82f   :  { %2628 = vmatpush3.bf16.xpose.msra.mxu1 %v919_v32  ;;  %2629 = vmatprep.mubr.msk.bf16.mxu1 %vm3012_vm1, %v3011_v1 }
 0x830   :  { %2639 = vmatprep.subr.bf16.mxu1 %v3011_v1 }
 0x831   :  { %v904_v34 = vpop.f32.mrb[8].mxu0 }
 0x832   :  { %v2625_v35 = vpop.f32.mrb[9].mxu0 }
 0x833   :  { %v907_v36 = vpop.f32.mrb[10].mxu0 }
 0x834   :  { %v2626_v37 = vpop.f32.mrb[11].mxu0 }
 0x836   :  { %2630 = vmatmul.mubr.msk.bf16.vlgmr.msra.gmra.mrb[20].mxu1 %vm574_vm2, %v912_v38 }
 0x837   :  { %2641 = vmatprep.mubr.msk.bf16.mxu1 %vm3012_vm1, %v3011_v1  ;;  %2640 = vmatpush3.bf16.msra.mxu1 %v1037_v22 }
 0x838   :  { %2651 = vmatprep.subr.bf16.mxu1 %v3011_v1 }
 0x901   :  { %v857_v39 = vpop.f32.mrb[16].mxu1 }
 0x902   :  { %v3446_v40 = vadd.f32 %v904_v34, %v857_v39  ;;  %v2619_v41 = vpop.f32.mrb[17].mxu1 }
 0x903   :  { %v860_v42 = vpop.f32.mrb[18].mxu1 }
 0x904   :  { %v3448_v43 = vadd.f32 %v907_v36, %v860_v42  ;;  %v2620_v45 = vpop.f32.mrb[19].mxu1 }
 0x909   :  { %v955_v46 = vpop.f32.mrb[20].mxu1 }
 0x90a   :  { %v956_v47 = vadd.f32 %v955_v46, %v3392_v8  ;;  %v2631_v49 = vpop.f32.mrb[21].mxu1 }
 0x90b   :  { %v958_v50 = vpop.f32.mrb[22].mxu1 }
 0x90c   :  { %v959_v51 = vadd.f32 %v958_v50, %v3394_v9  ;;  %v2632_v53 = vpop.f32.mrb[23].mxu1  ;;  %v962_v54 = vsel %vm622_vm13, %v956_v47, -inf  ;;  %v57_v50 = vld [vmem:[#allocation5 + $0x64] sm:$0xf] }
 0x90d   :  { %963 = vmax.xlane.f32.xlu1 %v962_v54 }
 0x90e   :  { %v965_v55 = vsel %vm622_vm13, %v959_v51, -inf }
 0x90f   :  { %966 = vmax.xlane.f32.xlu0 %v965_v55 }
 0x91e   :  { %985 = vrot.lane.b32.xlu1 %v3336_v44, %s3021_s0 }
 0x922   :  { %1082 = vrot.lane.b32.xlu1 %v3336_v44, %s3022_s1 }
 0x99a   :  { %v964_v56 = vpop.xlane.xlu1 %963 }
 0x99b   :  { %v968_v57 = vsub.f32 %v956_v47, %v964_v56 }
 0x99c   :  { %v967_v59 = vpop.xlane.xlu0 %966 }
 0x99d   :  { %v970_v60 = vmul.f32 1.442695, %v968_v57  ;;  %v969_v61 = vsub.f32 %v959_v51, %v967_v59  ;;  %v1208_v51 = vsel %vm819_vm9, %v57_v50, 0 }
 0x99e   :  { %v986_v62 = vpop.permute.xlu1 %985 }
 0x99f   :  { %2871 = vpow2.f32 %v970_v60  ;;  %v972_v63 = vmul.f32 1.442695, %v969_v61  ;;  %2634 = vmatpush3.bf16.msra.mxu0 %v986_v62 }
 0x9a0   :  { %2645 = vmatprep.subr.bf16.mxu0 %v3011_v1 }
 0x9a1   :  { %2873 = vpow2.f32 %v972_v63 }
 0x9a2   :  { %v1083_v20 = vpop.permute.xlu1 %1082 }
 0x9a9   :  { %v2872_v0 = vpop.eup %2871 }
 0x9aa   :  { %v974_v4 = vsel %vm622_vm13, %v2872_v0, 0.0 }
 0x9ab   :  { %v2874_v5 = vpop.eup %2873  ;;  %975 = vadd.xlane.f32.xlu0 %v974_v4 }
 0x9ac   :  { %v977_v6 = vsel %vm622_vm13, %v2874_v5, 0.0 }
 0x9af   :  { %978 = vadd.xlane.f32.xlu0 %v977_v6 }
 0x9c5   :  { %1084 = vrot.lane.b32.xlu0 %v3336_v44, %s3023_s30 }
 0xa38   :  { %v976_v7 = vpop.xlane.xlu0 %975 }
 0xa39   :  { %2875 = vrcp.f32 %v976_v7 }
 0xa3c   :  { %v979_v10 = vpop.xlane.xlu0 %978 }
 0xa3d   :  { %2877 = vrcp.f32 %v979_v10 }
 0xa40   :  { %v1085_v17 = vpop.permute.xlu0 %1084 }
 0xa41   :  { %v1090_v19 = vsel %vm574_vm2, %v1085_v17, 0  ;;  %v65_v17 = vld [vmem:[#allocation5 + $0x6c] sm:$0xf] }
 0xa43   :  { %v2876_v11 = vpop.eup %2875 }
 0xa44   :  { %v982_v15 = vmul.f32 %v2876_v11, %v2872_v0  ;;  %v62_v11 = vld [vmem:[#allocation5 + $0xc] sm:$0xf] }
 0xa47   :  { %v2878_v14 = vpop.eup %2877 }
 0xa48   :  { %v983_v16 = vmul.f32 %v2878_v14, %v2874_v5  ;;  %v63_v14 = vld [vmem:[#allocation5 + $0x2c] sm:$0xf] }
 0xa4a   :  { %v984_v18 = vpack.c.bf16 %v983_v16, %v982_v15  ;;  %v64_v15 = vld [vmem:[#allocation5 + $0x4c] sm:$0xf]  ;;  %v2426_v16 = vcombine.low %v62_v11, %v63_v14 }
 0xa4c   :  { %2636 = vmatmul.mubr.msk.bf16.vlgmr.msra.gmra.mrb[12].mxu0 %vm622_vm13, %v984_v18  ;;  %v2849_v18 = vld [vmem:[%s3723_s5] sm:$0xff]  }
 0xa4d   :  { %2646 = vmatpush3.bf16.xpose.msra.mxu0 %v1090_v19  ;;  %2647 = vmatprep.mubr.msk.bf16.mxu0 %vm3012_vm1, %v3011_v1  ;;  %v2427_v19 = vcombine.low %v64_v15, %v65_v17 }
 0xa4e   :  { %2657 = vmatprep.subr.bf16.mxu0 %v3011_v1 }
 0xa54   :  { %2648 = vmatmul.mubr.msk.bf16.vlgmr.msra.gmra.mrb[16].mxu0 %vm574_vm2, %v1083_v20  ;;  %v2850_v20 = vld [vmem:[%s3723_s5 + $0x8] sm:$0xff]  }
 0xa55   :  { %2659 = vmatprep.mubr.msk.bf16.mxu0 %vm3012_vm1, %v3011_v1  ;;  %2658 = vmatpush3.bf16.msra.mxu0 %v1208_v51 }
 0xa56   :  { %2671 = vmatprep.subr.bf16.mxu0 %v2426_v16 }
 0xb1f   :  { %v1025_v23 = vpop.f32.mrb[12].mxu0 }
 0xb20   :  { %v2637_v24 = vpop.f32.mrb[13].mxu0 }
 0xb21   :  { %v1028_v25 = vpop.f32.mrb[14].mxu0 }
 0xb22   :  { %v1032_v26 = vpack.c.bf16 %v1028_v25, %v1025_v23  ;;  %v2638_v27 = vpop.f32.mrb[15].mxu0 }
 0xb24   :  { %2642 = vmatmul.mubr.msk.bf16.vlgmr.msra.gmra.mrb[24].mxu1 %vm574_vm2, %v1032_v26 }
 0xb25   :  { %2653 = vmatprep.mubr.msk.bf16.mxu1 %vm3012_vm1, %v3011_v1 }
 0xb27   :  { %v1126_v29 = vpop.f32.mrb[16].mxu0 }
 0xb28   :  { %v1127_v30 = vadd.f32 %v1126_v29, %v3392_v8  ;;  %v2649_v31 = vpop.f32.mrb[17].mxu0 }
 0xb29   :  { %v1129_v32 = vpop.f32.mrb[18].mxu0 }
 0xb2a   :  { %v1130_v34 = vadd.f32 %v1129_v32, %v3394_v9  ;;  %v2650_v35 = vpop.f32.mrb[19].mxu0  ;;  %v1133_v36 = vsel %vm622_vm13, %v1127_v30, -inf }
 0xb2b   :  { %1134 = vmax.xlane.f32.xlu1 %v1133_v36  ;;  %v58_v35 = vld [vmem:[#allocation5 + $0x8] sm:$0xf] }
 0xb2c   :  { %v1136_v37 = vsel %vm622_vm13, %v1130_v34, -inf }
 0xb2d   :  { %1137 = vmax.xlane.f32.xlu0 %v1136_v37  ;;  %v60_v37 = vld [vmem:[#allocation5 + $0x48] sm:$0xf] }
 0xbb8   :  { %v1135_v38 = vpop.xlane.xlu1 %1134 }
 0xbb9   :  { %v1139_v39 = vsub.f32 %v1127_v30, %v1135_v38  ;;  %v61_v38 = vld [vmem:[#allocation5 + $0x68] sm:$0xf] }
 0xbba   :  { %v1138_v41 = vpop.xlane.xlu0 %1137 }
 0xbbb   :  { %v1141_v42 = vmul.f32 1.442695, %v1139_v39  ;;  %v1140_v45 = vsub.f32 %v1130_v34, %v1138_v41 }
 0xbbd   :  { %2879 = vpow2.f32 %v1141_v42  ;;  %v1143_v46 = vmul.f32 1.442695, %v1140_v45 }
 0xbbf   :  { %2881 = vpow2.f32 %v1143_v46 }
 0xbc7   :  { %v2880_v8 = vpop.eup %2879 }
 0xbc8   :  { %v1145_v47 = vsel %vm622_vm13, %v2880_v8, 0.0 }
 0xbc9   :  { %v2882_v49 = vpop.eup %2881  ;;  %1146 = vadd.xlane.f32.xlu0 %v1145_v47 }
 0xbca   :  { %v1148_v9 = vsel %vm622_vm13, %v2882_v49, 0.0 }
 0xbcb   :  { %1149 = vadd.xlane.f32.xlu1 %v1148_v9 }
 0xbdf   :  { %1156 = vrot.lane.b32.xlu0 %v3336_v44, %s3024_s7 }
 0xbf7   :  { %v1073_v53 = vpop.f32.mrb[24].mxu1 }
 0xbf8   :  { %v1080_v54 = vadd.f32 %v1073_v53, %v3446_v40  ;;  %v2643_v55 = vpop.f32.mrb[25].mxu1 }
 0xbf9   :  { %v1076_v56 = vpop.f32.mrb[26].mxu1 }
 0xbfa   :  { %v1081_v57 = vadd.f32 %v1076_v56, %v3448_v43  ;;  %v2644_v59 = vpop.f32.mrb[27].mxu1 }
 0xc56   :  { %v1147_v60 = vpop.xlane.xlu0 %1146 }
 0xc57   :  { %2883 = vrcp.f32 %v1147_v60 }
 0xc58   :  { %v1150_v61 = vpop.xlane.xlu1 %1149 }
 0xc59   :  { %2885 = vrcp.f32 %v1150_v61 }
 0xc5a   :  { %v1157_v62 = vpop.permute.xlu0 %1156 }
 0xc5b   :  { %2652 = vmatpush3.bf16.msra.mxu1 %v1157_v62 }
 0xc5c   :  { %2663 = vmatprep.subr.bf16.mxu1 %v3011_v1 }
 0xc61   :  { %v2884_v44 = vpop.eup %2883 }
 0xc62   :  { %v1153_v0 = vmul.f32 %v2884_v44, %v2880_v8 }
 0xc63   :  { %v2886_v63 = vpop.eup %2885 }
 0xc64   :  { %v1154_v4 = vmul.f32 %v2886_v63, %v2882_v49 }
 0xc66   :  { %v1155_v5 = vpack.c.bf16 %v1154_v4, %v1153_v0 }
 0xc68   :  { %2654 = vmatmul.mubr.msk.bf16.vlgmr.msra.gmra.mrb[28].mxu1 %vm622_vm13, %v1155_v5 }
 0xc69   :  { %2667 = vmatprep.mubr.msk.bf16.mxu1 %vm3012_vm1, %v3011_v1 }
 0xd3b   :  { %v1196_v40 = vpop.f32.mrb[28].mxu1 }
 0xd3c   :  { %v2655_v43 = vpop.f32.mrb[29].mxu1 }
 0xd3d   :  { %v1199_v6 = vpop.f32.mrb[30].mxu1 }
 0xd3e   :  { %v1203_v7 = vpack.c.bf16 %v1199_v6, %v1196_v40  ;;  %v2656_v10 = vpop.f32.mrb[31].mxu1 }
 0xd40   :  { %2660 = vmatmul.mubr.msk.bf16.vlgmr.msra.gmra.mrb[20].mxu0 %vm574_vm2, %v1203_v7  ;;  %v484_v7 = vshra.s32 %v3094_v3, 4 }
 0xd41   :  { %2675 = vmatprep.mubr.msk.bf16.mxu0 %vm491_vm0, %v2849_v18  ;;  %2672 = vmatpush3.bf16.msra.mxu0 %v2426_v16 }
 0xd42   :  { %2673 = vmatprep.subr.bf16.mxu0 %v2427_v19  ;;  %vm485_vm14 = vcmp.eq.s32.totalorder %v326_v48, %v484_v7  ;;  %vm486_vm15 = vcmp.eq.s32.totalorder %v327_v52, %v484_v7 }
 0xd43   :  { %v3553_v10 = vsel %vm485_vm14, 0.0, %v3014_v58  ;;  %v3556_v14 = vsel %vm486_vm15, 0.0, %v3014_v58 }
 0xd45   :  { %2674 = vmatpush3.bf16.msra.mxu0 %v2427_v19 }
 0xd46   :  { %2687 = vmatprep.subr.bf16.mxu0 %v3011_v1 }
 0xd48   :  { %2676 = vmatmul.mubr.msk.bf16.vlgmr.msra.gmra.mrb[24].mxu0 %vm491_vm0, %v2850_v20 }
 0xd49   :  { %2691 = vmatprep.mubr.msk.bf16.mxu0 %vm3012_vm1, %v3011_v1 }
 0xe13   :  { %v1244_v21 = vpop.f32.mrb[20].mxu0 }
 0xe14   :  { %v1251_v22 = vadd.f32 %v1244_v21, %v1080_v54  ;;  %v2661_v23 = vpop.f32.mrb[21].mxu0  ;;  %v1273_v54 = vsub.s32 1, %v3088_v2 }
 0xe15   :  { %v1247_v24 = vpop.f32.mrb[22].mxu0 }
 0xe16   :  { %v3502_v25 = vadd.f32 %v1251_v22, %v3310_v13  ;;  %v1252_v26 = vadd.f32 %v1247_v24, %v1081_v57  ;;  %v2662_v27 = vpop.f32.mrb[23].mxu0  ;;  %v59_v13 = vld [vmem:[#allocation5 + $0x28] sm:$0xf]  ;;  %v1274_v57 = vrot.slane %v3328_v33, %v1273_v54 }
 0xe17   :  { %v2421_v36 = vcombine.low %v58_v35, %v59_v13 }
 0xe18   :  { %v3505_v29 = vadd.f32 %v3308_v12, %v1252_v26  ;;  %v1255_v30 = vmul.f32 %v3502_v25, %v3502_v25  ;;  %v2422_v12 = vcombine.low %v60_v37, %v61_v38 }
 0xe19   :  { %2664 = vmatpush3.bf16.msra.mxu1 %v2421_v36 }
 0xe1a   :  { %v1257_v31 = vsel %vm491_vm0, %v1255_v30, 0.0  ;;  %v1256_v32 = vmul.f32 %v3505_v29, %v3505_v29  ;;  %2665 = vmatprep.subr.bf16.mxu1 %v3011_v1 }
 0xe1b   :  { %1258 = vadd.xlane.f32.xlu1 %v1257_v31  ;;  %v2677_v39 = vpop.f32.mrb[24].mxu0 }
 0xe1c   :  { %v1260_v34 = vsel %vm491_vm0, %v1256_v32, 0.0  ;;  %v1397_v41 = vpop.f32.mrb[25].mxu0 }
 0xe1d   :  { %2666 = vmatpush3.bf16.msra.mxu1 %v2422_v12  ;;  %v2678_v42 = vpop.f32.mrb[26].mxu0 }
 0xe1e   :  { %2679 = vmatprep.subr.bf16.mxu1 %v3011_v1  ;;  %v3515_v45 = vpack.c.bf16 %v2678_v42, %v2677_v39  ;;  %v1400_v46 = vpop.f32.mrb[27].mxu0 }
 0xe1f   :  { %1261 = vadd.xlane.f32.xlu1 %v1260_v34  ;;  %v3517_v8 = vpack.c.bf16 %v1400_v46, %v1397_v41  ;;  %v66_v46 = vld [vmem:[#allocation5 + $0x10] sm:$0xf] }
 0xe20   :  { %v1421_v33 = vsel %vm574_vm2, %v3515_v45, 0 }
 0xe21   :  { %1489 = vrot.lane.b32.xlu0 %v3517_v8, %s3013_s14  ;;  %v1418_v63 = vsel %vm574_vm2, %v3517_v8, 0 }
 0xe25   :  { %1543 = vrot.lane.b32.xlu0 %v3517_v8, %s3017_s26 }
 0xe29   :  { %1545 = vrot.lane.b32.xlu0 %v3515_v45, %s3017_s26 }
 0xe93   :  { %v1490_v0 = vpop.permute.xlu0 %1489 }
 0xe94   :  { %2688 = vmatpush3.bf16.msra.mxu0 %v1490_v0 }
 0xe95   :  { %2689 = vmatprep.subr.bf16.mxu0 %v3011_v1 }
 0xe97   :  { %v1544_v38 = vpop.permute.xlu0 %1543 }
 0xe98   :  { %v1551_v12 = vsel %vm574_vm2, %v1544_v38, 0 }
 0xe9b   :  { %v1546_v39 = vpop.permute.xlu0 %1545 }
 0xe9c   :  { %v1554_v41 = vsel %vm574_vm2, %v1546_v39, 0 }
 0xea8   :  { %v1259_v47 = vpop.xlane.xlu1 %1258 }
 0xea9   :  { %v1263_v49 = vmul.f32 0.03125, %v1259_v47  ;;  %v1722_v47 = vsel %vm819_vm9, %v66_v46, 0 }
 0xeab   :  { %v1265_v9 = vadd.f32 1e-06, %v1263_v49 }
 0xeac   :  { %v1262_v50 = vpop.xlane.xlu1 %1261 }
 0xead   :  { %2887 = vrsqrt.f32 %v1265_v9  ;;  %v1264_v51 = vmul.f32 0.03125, %v1262_v50 }
 0xeaf   :  { %v1266_v53 = vadd.f32 1e-06, %v1264_v51 }
 0xeb1   :  { %2889 = vrsqrt.f32 %v1266_v53 }
 0xeb7   :  { %v2888_v55 = vpop.eup %2887 }
 0xeb8   :  { %v1269_v56 = vmul.f32 %v2888_v55, %v3502_v25 }
 0xeba   :  { %v1275_v61 = vmul.f32 %v1274_v57, %v1269_v56 }
 0xebb   :  { %v2890_v59 = vpop.eup %2889 }
 0xebc   :  { %v1270_v60 = vmul.f32 %v2890_v59, %v3505_v29 }
 0xebe   :  { %v1276_v62 = vmul.f32 %v1274_v57, %v1270_v60 }
 0xec0   :  { %v1277_v44 = vpack.c.bf16 %v1276_v62, %v1275_v61 }
 0xec2   :  { %2668 = vmatmul.mubr.msk.bf16.vlgmr.msra.gmra.mrb[32].mxu1 %vm491_vm0, %v1277_v44 }
 0xec3   :  { %2680 = vmatpush3.bf16.xpose.msra.mxu1 %v1418_v63  ;;  %2683 = vmatprep.mubr.msk.bf16.mxu1 %vm3012_vm1, %v3011_v1 }
 0xec4   :  { %2681 = vmatprep.subr.bf16.mxu1 %v3011_v1 }
 0xecb   :  { %2682 = vmatpush3.bf16.xpose.msra.mxu1 %v1421_v33 }
 0xecc   :  { %2703 = vmatprep.subr.bf16.mxu1 %v3011_v1 }
 0xf95   :  { %v1327_v4 = vpop.f32.mrb[32].mxu1 }
 0xf96   :  { %v2669_v5 = vpop.f32.mrb[33].mxu1 }
 0xf97   :  { %v1330_v40 = vpop.f32.mrb[34].mxu1 }
 0xf98   :  { %v3539_v43 = vpack.c.bf16 %v1330_v40, %v1327_v4  ;;  %v2670_v6 = vpop.f32.mrb[35].mxu1 }
 0xf9a   :  { %1541 = vrot.lane.b32.xlu0 %v3539_v43, %s3017_s26  ;;  %2684 = vmatmul.mubr.msk.bf16.vlgmr.msra.gmra.mrb[36].mxu1 %vm574_vm2, %v3539_v43 }
 0xf9b   :  { %2707 = vmatprep.mubr.msk.bf16.mxu1 %vm3012_vm1, %v3011_v1 }
0x100c   :  { %v1542_v42 = vpop.permute.xlu0 %1541 }
0x106d   :  { %v1457_v11 = vpop.f32.mrb[36].mxu1 }
0x106e   :  { %v1458_v15 = vadd.f32 %v1457_v11, %v3553_v10  ;;  %v2685_v16 = vpop.f32.mrb[37].mxu1 }
0x106f   :  { %v1460_v17 = vpop.f32.mrb[38].mxu1 }
0x1070   :  { %v1461_v18 = vadd.f32 %v1460_v17, %v3556_v14  ;;  %v2686_v3 = vpop.f32.mrb[39].mxu1  ;;  %v1464_v19 = vsel %vm491_vm0, %v1458_v15, -inf }
0x1071   :  { %1465 = vmax.xlane.f32.xlu1 %v1464_v19 }
0x1072   :  { %v1467_v28 = vsel %vm491_vm0, %v1461_v18, -inf }
0x1075   :  { %1468 = vmax.xlane.f32.xlu1 %v1467_v28 }
0x10fe   :  { %v1466_v48 = vpop.xlane.xlu1 %1465 }
0x10ff   :  { %v1470_v52 = vsub.f32 %v1458_v15, %v1466_v48 }
0x1101   :  { %v1472_v20 = vmul.f32 1.442695, %v1470_v52 }
0x1102   :  { %v1469_v21 = vpop.xlane.xlu1 %1468 }
0x1103   :  { %2891 = vpow2.f32 %v1472_v20  ;;  %v1471_v58 = vsub.f32 %v1461_v18, %v1469_v21  ;;  %v67_v20 = vld [vmem:[#allocation5 + $0x30] sm:$0xf] }
0x1105   :  { %v1474_v22 = vmul.f32 1.442695, %v1471_v58 }
0x1107   :  { %2893 = vpow2.f32 %v1474_v22 }
0x110d   :  { %v2892_v23 = vpop.eup %2891 }
0x110e   :  { %v1476_v24 = vsel %vm491_vm0, %v2892_v23, 0.0 }
0x110f   :  { %1477 = vadd.xlane.f32.xlu1 %v1476_v24 }
0x1111   :  { %v2894_v26 = vpop.eup %2893 }
0x1112   :  { %v1479_v27 = vsel %vm491_vm0, %v2894_v26, 0.0 }
0x1113   :  { %1480 = vadd.xlane.f32.xlu1 %v1479_v27 }
0x1124   :  { %1491 = vrot.lane.b32.xlu1 %v3515_v45, %s3013_s14 }
0x119c   :  { %v1478_v30 = vpop.xlane.xlu1 %1477 }
0x119d   :  { %2895 = vrcp.f32 %v1478_v30 }
0x11a0   :  { %v1481_v31 = vpop.xlane.xlu1 %1480 }
0x11a1   :  { %2897 = vrcp.f32 %v1481_v31 }
0x11a4   :  { %v1492_v32 = vpop.permute.xlu1 %1491 }
0x11a5   :  { %2690 = vmatpush3.bf16.msra.mxu0 %v1492_v32 }
0x11a6   :  { %2695 = vmatprep.subr.bf16.mxu0 %v3011_v1 }
0x11a7   :  { %v2896_v34 = vpop.eup %2895 }
0x11a8   :  { %v1484_v13 = vmul.f32 %v2896_v34, %v2892_v23  ;;  %v1675_v23 = vsel %vm819_vm9, %v67_v20, 0 }
0x11ab   :  { %v2898_v35 = vpop.eup %2897 }
0x11ac   :  { %v1485_v36 = vmul.f32 %v2898_v35, %v2894_v26 }
0x11ae   :  { %v1486_v37 = vpack.c.bf16 %v1485_v36, %v1484_v13 }
0x11b0   :  { %2692 = vmatmul.mubr.msk.bf16.vlgmr.msra.gmra.mrb[28].mxu0 %vm491_vm0, %v1486_v37 }
0x11b1   :  { %2696 = vmatpush3.bf16.xpose.msra.mxu0 %v1551_v12  ;;  %2699 = vmatprep.mubr.msk.bf16.mxu0 %vm3012_vm1, %v3011_v1 }
0x11b2   :  { %2697 = vmatprep.subr.bf16.mxu0 %v3011_v1 }
0x11b9   :  { %2698 = vmatpush3.bf16.xpose.msra.mxu0 %v1554_v41 }
0x11ba   :  { %2717 = vmatprep.subr.bf16.mxu0 %v3011_v1 }
0x11c0   :  { %2700 = vmatmul.mubr.msk.bf16.vlgmr.msra.gmra.mrb[32].mxu0 %vm574_vm2, %v1542_v42 }
0x11c1   :  { %2719 = vmatprep.mubr.msk.bf16.mxu0 %vm3012_vm1, %v3011_v1  ;;  %2718 = vmatpush3.bf16.msra.mxu0 %v1722_v47 }
0x11c2   :  { %2731 = vmatprep.subr.bf16.mxu0 %v3011_v1 }
0x1283   :  { %v1532_v49 = vpop.f32.mrb[28].mxu0 }
0x1284   :  { %v2693_v9 = vpop.f32.mrb[29].mxu0 }
0x1285   :  { %v1535_v50 = vpop.f32.mrb[30].mxu0 }
0x1286   :  { %v1539_v51 = vpack.c.bf16 %v1535_v50, %v1532_v49  ;;  %v2694_v53 = vpop.f32.mrb[31].mxu0 }
0x1288   :  { %2720 = vmatmul.mubr.msk.bf16.vlgmr.msra.gmra.mrb[36].mxu0 %vm574_vm2, %v1539_v51 }
0x1289   :  { %2735 = vmatprep.mubr.msk.bf16.mxu0 %vm3012_vm1, %v3011_v1 }
0x1293   :  { %v1590_v54 = vpop.f32.mrb[32].mxu0 }
0x1294   :  { %v1591_v55 = vadd.f32 %v1590_v54, %v3553_v10  ;;  %v2701_v56 = vpop.f32.mrb[33].mxu0 }
0x1295   :  { %v1593_v57 = vpop.f32.mrb[34].mxu0 }
0x1296   :  { %v1594_v59 = vadd.f32 %v1593_v57, %v3556_v14  ;;  %v2702_v60 = vpop.f32.mrb[35].mxu0  ;;  %v1597_v61 = vsel %vm491_vm0, %v1591_v55, -inf }
0x1297   :  { %1598 = vmax.xlane.f32.xlu0 %v1597_v61 }
0x1298   :  { %v1600_v62 = vsel %vm491_vm0, %v1594_v59, -inf }
0x1299   :  { %1601 = vmax.xlane.f32.xlu1 %v1600_v62 }
0x12aa   :  { %1622 = vrot.lane.b32.xlu1 %v3515_v45, %s3015_s25 }
0x12ae   :  { %1767 = vrot.lane.b32.xlu1 %v3517_v8, %s3020_s29 }
0x12b2   :  { %1769 = vrot.lane.b32.xlu1 %v3515_v45, %s3020_s29 }
0x12b6   :  { %1946 = vrot.lane.b32.xlu1 %v3517_v8, %s3022_s1 }
0x12ba   :  { %1944 = vrot.lane.b32.xlu1 %v3539_v43, %s3022_s1 }
0x1324   :  { %v1599_v44 = vpop.xlane.xlu0 %1598 }
0x1325   :  { %v1603_v63 = vsub.f32 %v1591_v55, %v1599_v44 }
0x1326   :  { %v1602_v33 = vpop.xlane.xlu1 %1601 }
0x1327   :  { %v1605_v0 = vmul.f32 1.442695, %v1603_v63  ;;  %v1604_v4 = vsub.f32 %v1594_v59, %v1602_v33 }
0x1329   :  { %2899 = vpow2.f32 %v1605_v0  ;;  %v1607_v5 = vmul.f32 1.442695, %v1604_v4 }
0x132a   :  { %v1623_v48 = vpop.permute.xlu1 %1622 }
0x132b   :  { %2901 = vpow2.f32 %v1607_v5 }
0x132e   :  { %v1768_v27 = vpop.permute.xlu1 %1767 }
0x132f   :  { %v1775_v34 = vsel %vm574_vm2, %v1768_v27, 0 }
0x1332   :  { %v1770_v35 = vpop.permute.xlu1 %1769 }
0x1333   :  { %v2900_v40 = vpop.eup %2899  ;;  %v1778_v13 = vsel %vm574_vm2, %v1770_v35, 0  ;;  %v68_v35 = vld [vmem:[#allocation5 + $0x50] sm:$0xf] }
0x1334   :  { %v1609_v6 = vsel %vm491_vm0, %v2900_v40, 0.0 }
0x1335   :  { %v2902_v7 = vpop.eup %2901  ;;  %1610 = vadd.xlane.f32.xlu0 %v1609_v6 }
0x1336   :  { %v1612_v11 = vsel %vm491_vm0, %v2902_v7, 0.0  ;;  %v1947_v36 = vpop.permute.xlu1 %1946 }
0x1337   :  { %v1954_v38 = vsel %vm574_vm2, %v1947_v36, 0 }
0x1339   :  { %1613 = vadd.xlane.f32.xlu0 %v1612_v11 }
0x133a   :  { %v1945_v41 = vpop.permute.xlu1 %1944 }
0x134f   :  { %1620 = vrot.lane.b32.xlu0 %v3517_v8, %s3015_s25 }
0x1353   :  { %1765 = vrot.lane.b32.xlu0 %v3539_v43, %s3020_s29 }
0x1357   :  { %1948 = vrot.lane.b32.xlu0 %v3515_v45, %s3022_s1 }
0x135b   :  { %v1758_v15 = vpop.f32.mrb[36].mxu0 }
0x135c   :  { %v2721_v16 = vpop.f32.mrb[37].mxu0 }
0x135d   :  { %v1761_v17 = vpop.f32.mrb[38].mxu0 }
0x135e   :  { %v2722_v18 = vpop.f32.mrb[39].mxu0 }
0x13c2   :  { %v1611_v3 = vpop.xlane.xlu0 %1610 }
0x13c3   :  { %2903 = vrcp.f32 %v1611_v3 }
0x13c6   :  { %v1614_v19 = vpop.xlane.xlu0 %1613 }
0x13c7   :  { %2905 = vrcp.f32 %v1614_v19 }
0x13ca   :  { %v1621_v28 = vpop.permute.xlu0 %1620 }
0x13cb   :  { %2704 = vmatpush3.bf16.msra.mxu1 %v1621_v28 }
0x13cc   :  { %2705 = vmatprep.subr.bf16.mxu1 %v3011_v1 }
0x13cd   :  { %v2904_v52 = vpop.eup %2903 }
0x13ce   :  { %v1617_v21 = vmul.f32 %v2904_v52, %v2900_v40  ;;  %v1766_v37 = vpop.permute.xlu0 %1765 }
0x13cf   :  { %2706 = vmatpush3.bf16.msra.mxu1 %v1623_v48 }
0x13d0   :  { %2711 = vmatprep.subr.bf16.mxu1 %v3011_v1 }
0x13d1   :  { %v2906_v43 = vpop.eup %2905 }
0x13d2   :  { %v1618_v58 = vmul.f32 %v2906_v43, %v2902_v7  ;;  %v1949_v12 = vpop.permute.xlu0 %1948 }
0x13d3   :  { %v1957_v39 = vsel %vm574_vm2, %v1949_v12, 0 }
0x13d4   :  { %v1619_v22 = vpack.c.bf16 %v1618_v58, %v1617_v21 }
0x13d6   :  { %2708 = vmatmul.mubr.msk.bf16.vlgmr.msra.gmra.mrb[40].mxu1 %vm491_vm0, %v1619_v22 }
0x13d7   :  { %2712 = vmatpush3.bf16.msra.mxu1 %v1675_v23  ;;  %2713 = vmatprep.mubr.msk.bf16.mxu1 %vm3012_vm1, %v3011_v1 }
0x13d8   :  { %2723 = vmatprep.subr.bf16.mxu1 %v3011_v1 }
0x14a9   :  { %v1663_v24 = vpop.f32.mrb[40].mxu1 }
0x14aa   :  { %v2709_v26 = vpop.f32.mrb[41].mxu1 }
0x14ab   :  { %v1666_v30 = vpop.f32.mrb[42].mxu1 }
0x14ac   :  { %v1670_v31 = vpack.c.bf16 %v1666_v30, %v1663_v24  ;;  %v2710_v32 = vpop.f32.mrb[43].mxu1 }
0x14ae   :  { %2714 = vmatmul.mubr.msk.bf16.vlgmr.msra.gmra.mrb[44].mxu1 %vm574_vm2, %v1670_v31 }
0x14af   :  { %2724 = vmatpush3.bf16.xpose.msra.mxu1 %v1775_v34  ;;  %2727 = vmatprep.mubr.msk.bf16.mxu1 %vm3012_vm1, %v3011_v1 }
0x14b0   :  { %2725 = vmatprep.subr.bf16.mxu1 %v3011_v1 }
0x14b7   :  { %2726 = vmatpush3.bf16.xpose.msra.mxu1 %v1778_v13  ;;  %v1899_v13 = vsel %vm819_vm9, %v68_v35, 0  ;;  %v2931_v35 = vld [vmem:[%s3722_s4] sm:$0xf]  ;;  %s3025_s4 = smov [#allocation8]  }
0x14b8   :  { %2745 = vmatprep.subr.bf16.mxu1 %v3011_v1  ;;  %s2364_s12 = sshll.u32 %s3025_s4, 4  ;;  %s2365_s12 = int_to_ptr.vmem [resolvable:$true] %s2364_s12 }
0x14b9   :  { %s2978_s2 = scalar_lea.vmem %s2365_s12, 256  ;;  %p2983_p5 = scmp.lt.s32.totalorder %s2365_s12, %s2365_s12 }
0x14ba   :  { %p2979_p4 = scmp.ne.s32.totalorder %s2365_s12, %s2978_s2  ;;  %p2984_p6 = scmp.lt.s32.totalorder %s2978_s2, %s2978_s2 }
0x14bc   :  { %p2985_p7 = por %p2984_p6, %p2983_p5 }
0x14be   :  { %2728 = vmatmul.mubr.msk.bf16.vlgmr.msra.gmra.mrb[48].mxu1 %vm574_vm2, %v1766_v37  ;;  %p2986_p8 = pnand %p2985_p7, %p2979_p4 }
0x14bf   :  { %2746 = vmatpush3.bf16.xpose.msra.mxu1 %v1954_v38  ;;  %2749 = vmatprep.mubr.msk.bf16.mxu1 %vm3012_vm1, %v3011_v1 }
0x14c0   :  { %2747 = vmatprep.subr.bf16.mxu1 %v3011_v1 }
0x14c7   :  { %2748 = vmatpush3.bf16.xpose.msra.mxu1 %v1957_v39 }
0x14c8   :  { %2767 = vmatprep.subr.bf16.mxu1 %v3011_v1 }
0x14ce   :  { %2750 = vmatmul.mubr.msk.bf16.vlgmr.msra.gmra.mrb[52].mxu1 %vm574_vm2, %v1945_v41 }
0x14cf   :  { %2771 = vmatprep.mubr.msk.bf16.mxu1 %vm3012_vm1, %v3011_v1 }
0x1581   :  { %v1711_v42 = vpop.f32.mrb[44].mxu1 }
0x1582   :  { %v3628_v46 = vadd.f32 %v1758_v15, %v1711_v42  ;;  %v2715_v47 = vpop.f32.mrb[45].mxu1 }
0x1583   :  { %v1714_v49 = vpop.f32.mrb[46].mxu1 }
0x1584   :  { %v3630_v9 = vadd.f32 %v1761_v17, %v1714_v49  ;;  %v2716_v50 = vpop.f32.mrb[47].mxu1 }
0x1591   :  { %v1814_v51 = vpop.f32.mrb[48].mxu1 }
0x1592   :  { %v1815_v53 = vadd.f32 %v1814_v51, %v3553_v10  ;;  %v2729_v54 = vpop.f32.mrb[49].mxu1 }
0x1593   :  { %v1817_v55 = vpop.f32.mrb[50].mxu1 }
0x1594   :  { %v1818_v56 = vadd.f32 %v1817_v55, %v3556_v14  ;;  %v2730_v57 = vpop.f32.mrb[51].mxu1  ;;  %v1821_v59 = vsel %vm491_vm0, %v1815_v53, -inf  ;;  %v69_v55 = vld [vmem:[#allocation5 + $0x70] sm:$0xf] }
0x1595   :  { %1822 = vmax.xlane.f32.xlu0 %v1821_v59 }
0x1596   :  { %v1824_v60 = vsel %vm491_vm0, %v1818_v56, -inf }
0x1597   :  { %1825 = vmax.xlane.f32.xlu1 %v1824_v60 }
0x15a1   :  { %v1993_v61 = vpop.f32.mrb[52].mxu1 }
0x15a2   :  { %v2751_v62 = vpop.f32.mrb[53].mxu1  ;;  %v1994_v33 = vadd.f32 %v1993_v61, %v3553_v10 }
0x15a3   :  { %v1996_v44 = vpop.f32.mrb[54].mxu1 }
0x15a4   :  { %v2752_v63 = vpop.f32.mrb[55].mxu1  ;;  %v2000_v0 = vsel %vm491_vm0, %v1994_v33, -inf  ;;  %v1997_v48 = vadd.f32 %v1996_v44, %v3556_v14 }
0x15a6   :  { %v2003_v52 = vsel %vm491_vm0, %v1997_v48, -inf }
0x15a8   :  { %1846 = vrot.lane.b32.xlu1 %v3515_v45, %s3018_s27 }
0x15cc   :  { %2001 = vmax.xlane.f32.xlu1 %v2000_v0 }
0x1622   :  { %v1823_v4 = vpop.xlane.xlu0 %1822 }
0x1623   :  { %v1827_v5 = vsub.f32 %v1815_v53, %v1823_v4 }
0x1624   :  { %v1826_v40 = vpop.xlane.xlu1 %1825 }
0x1625   :  { %v1829_v6 = vmul.f32 1.442695, %v1827_v5  ;;  %v1828_v7 = vsub.f32 %v1818_v56, %v1826_v40  ;;  %v2078_v56 = vsel %vm819_vm9, %v69_v55, 0 }
0x1627   :  { %2907 = vpow2.f32 %v1829_v6  ;;  %v1831_v11 = vmul.f32 1.442695, %v1828_v7 }
0x1628   :  { %v1847_v10 = vpop.permute.xlu1 %1846 }
0x1629   :  { %2909 = vpow2.f32 %v1831_v11 }
0x1631   :  { %v2908_v15 = vpop.eup %2907 }
0x1632   :  { %v1833_v16 = vsel %vm491_vm0, %v2908_v15, 0.0 }
0x1633   :  { %v2910_v17 = vpop.eup %2909  ;;  %1834 = vadd.xlane.f32.xlu0 %v1833_v16 }
0x1634   :  { %v1836_v18 = vsel %vm491_vm0, %v2910_v17, 0.0 }
0x1637   :  { %1837 = vadd.xlane.f32.xlu0 %v1836_v18 }
0x164d   :  { %1844 = vrot.lane.b32.xlu0 %v3517_v8, %s3018_s27 }
0x1659   :  { %v2002_v3 = vpop.xlane.xlu1 %2001 }
0x165a   :  { %v2006_v19 = vsub.f32 %v1994_v33, %v2002_v3 }
0x165c   :  { %v2008_v28 = vmul.f32 1.442695, %v2006_v19  ;;  %v70_v19 = vld [vmem:[#allocation5 + $0x14] sm:$0xf] }
0x165e   :  { %2911 = vpow2.f32 %v2008_v28 }
0x1668   :  { %v2912_v43 = vpop.eup %2911 }
0x1669   :  { %v2012_v20 = vsel %vm491_vm0, %v2912_v43, 0.0 }
0x166c   :  { %2004 = vmax.xlane.f32.xlu0 %v2003_v52  ;;  %v73_v52 = vld [vmem:[#allocation5 + $0x74] sm:$0xf] }
0x1670   :  { %2013 = vadd.xlane.f32.xlu0 %v2012_v20  ;;  %v75_v20 = vld [vmem:[#allocation5 + $0x38] sm:$0xf] }
0x1686   :  { %2023 = vrot.lane.b32.xlu0 %v3517_v8, %s3023_s30 }
0x16c0   :  { %v1835_v21 = vpop.xlane.xlu0 %1834 }
0x16c1   :  { %2913 = vrcp.f32 %v1835_v21  ;;  %v76_v21 = vld [vmem:[#allocation5 + $0x58] sm:$0xf] }
0x16c4   :  { %v1838_v58 = vpop.xlane.xlu0 %1837 }
0x16c5   :  { %2915 = vrcp.f32 %v1838_v58 }
0x16c8   :  { %v1845_v22 = vpop.permute.xlu0 %1844 }
0x16c9   :  { %2732 = vmatpush3.bf16.msra.mxu0 %v1845_v22  ;;  %v77_v22 = vld [vmem:[#allocation5 + $0x78] sm:$0xf] }
0x16ca   :  { %2733 = vmatprep.subr.bf16.mxu0 %v3011_v1 }
0x16cb   :  { %v2914_v23 = vpop.eup %2913 }
0x16cc   :  { %v1841_v24 = vmul.f32 %v2914_v23, %v2908_v15  ;;  %v2446_v23 = vcombine.low %v76_v21, %v77_v22 }
0x16cd   :  { %2734 = vmatpush3.bf16.msra.mxu0 %v1847_v10 }
0x16ce   :  { %2739 = vmatprep.subr.bf16.mxu0 %v3011_v1 }
0x16cf   :  { %v2916_v14 = vpop.eup %2915 }
0x16d0   :  { %v1842_v26 = vmul.f32 %v2916_v14, %v2910_v17 }
0x16d2   :  { %v1843_v27 = vpack.c.bf16 %v1842_v26, %v1841_v24 }
0x16d4   :  { %2736 = vmatmul.mubr.msk.bf16.vlgmr.msra.gmra.mrb[40].mxu0 %vm491_vm0, %v1843_v27 }
0x16d5   :  { %2741 = vmatprep.mubr.msk.bf16.mxu0 %vm3012_vm1, %v3011_v1  ;;  %2740 = vmatpush3.bf16.msra.mxu0 %v1899_v13 }
0x16d6   :  { %2753 = vmatprep.subr.bf16.mxu0 %v3011_v1 }
0x16f9   :  { %v2005_v8 = vpop.xlane.xlu0 %2004 }
0x16fa   :  { %v2007_v30 = vsub.f32 %v1997_v48, %v2005_v8  ;;  %v72_v48 = vld [vmem:[#allocation5 + $0x54] sm:$0xf] }
0x16fc   :  { %v2010_v31 = vmul.f32 1.442695, %v2007_v30 }
0x16fd   :  { %v2014_v37 = vpop.xlane.xlu0 %2013 }
0x16fe   :  { %2917 = vpow2.f32 %v2010_v31  ;;  %v2143_v31 = vsub.s32 2, %v3088_v2 }
0x1700   :  { %v2144_v13 = vrot.slane %v2931_v35, %v2143_v31 }
0x1701   :  { %v2024_v49 = vpop.permute.xlu0 %2023 }
0x1708   :  { %v2918_v32 = vpop.eup %2917 }
0x1709   :  { %v2015_v34 = vsel %vm491_vm0, %v2918_v32, 0.0 }
0x170a   :  { %2016 = vadd.xlane.f32.xlu1 %v2015_v34 }
0x171b   :  { %2025 = vrot.lane.b32.xlu1 %v3515_v45, %s3023_s30 }
0x1797   :  { %v2017_v36 = vpop.xlane.xlu1 %2016 }
0x1798   :  { %2919 = vrcp.f32 %v2017_v36 }
0x1799   :  { %2921 = vrcp.f32 %v2014_v37 }
0x179b   :  { %v2026_v53 = vpop.permute.xlu1 %2025 }
0x17a2   :  { %v2920_v47 = vpop.eup %2919 }
0x17a3   :  { %v2922_v45 = vpop.eup %2921  ;;  %v2021_v50 = vmul.f32 %v2920_v47, %v2918_v32 }
0x17a4   :  { %v2020_v51 = vmul.f32 %v2922_v45, %v2912_v43  ;;  %v74_v43 = vld [vmem:[#allocation5 + $0x18] sm:$0xf] }
0x17a5   :  { %v2445_v58 = vcombine.low %v74_v43, %v75_v20  ;;  %v81_v45 = vld [vmem:[#allocation5 + $0xf8] sm:$0xf] }
0x17a6   :  { %v2022_v54 = vpack.c.bf16 %v2021_v50, %v2020_v51 }
0x17a7   :  { %v1887_v38 = vpop.f32.mrb[40].mxu0 }
0x17a8   :  { %v2737_v12 = vpop.f32.mrb[41].mxu0 }
0x17a9   :  { %v1890_v39 = vpop.f32.mrb[42].mxu0 }
0x17aa   :  { %v1894_v41 = vpack.c.bf16 %v1890_v39, %v1887_v38  ;;  %v2738_v42 = vpop.f32.mrb[43].mxu0 }
0x17ab   :  { %v79_v42 = vld [vmem:[#allocation5 + $0xb8] sm:$0xf] }
0x17ac   :  { %2742 = vmatmul.mubr.msk.bf16.vlgmr.msra.gmra.mrb[44].mxu0 %vm574_vm2, %v1894_v41  ;;  %v78_v41 = vld [vmem:[#allocation5 + $0x98] sm:$0xf] }
0x17ad   :  { %2754 = vmatpush3.bf16.msra.mxu0 %v2024_v49  ;;  %2757 = vmatprep.mubr.msk.bf16.mxu0 %vm3012_vm1, %v3011_v1  ;;  %v2447_v47 = vcombine.low %v78_v41, %v79_v42  ;;  %v80_v49 = vld [vmem:[#allocation5 + $0xd8] sm:$0xf] }
0x17ae   :  { %2755 = vmatprep.subr.bf16.mxu0 %v3011_v1  ;;  %v2448_v50 = vcombine.low %v80_v49, %v81_v45 }
0x17b1   :  { %2756 = vmatpush3.bf16.msra.mxu0 %v2026_v53 }
0x17b2   :  { %2761 = vmatprep.subr.bf16.mxu0 %v3011_v1 }
0x17b4   :  { %2758 = vmatmul.mubr.msk.bf16.vlgmr.msra.gmra.mrb[48].mxu0 %vm491_vm0, %v2022_v54 }
0x17b5   :  { %2763 = vmatprep.mubr.msk.bf16.mxu0 %vm3012_vm1, %v3011_v1  ;;  %2762 = vmatpush3.bf16.msra.mxu0 %v2078_v56 }
0x17b6   :  { %2775 = vmatprep.subr.bf16.mxu0 %v3011_v1 }
0x187f   :  { %v1935_v57 = vpop.f32.mrb[44].mxu0 }
0x1880   :  { %v1942_v59 = vadd.f32 %v1935_v57, %v3628_v46  ;;  %v2743_v60 = vpop.f32.mrb[45].mxu0 }
0x1881   :  { %v1938_v61 = vpop.f32.mrb[46].mxu0 }
0x1882   :  { %v1943_v62 = vadd.f32 %v1938_v61, %v3630_v9  ;;  %v2744_v44 = vpop.f32.mrb[47].mxu0 }
0x1887   :  { %v2066_v63 = vpop.f32.mrb[48].mxu0 }
0x1888   :  { %v2759_v33 = vpop.f32.mrb[49].mxu0 }
0x1889   :  { %v2069_v0 = vpop.f32.mrb[50].mxu0 }
0x188a   :  { %v2073_v4 = vpack.c.bf16 %v2069_v0, %v2066_v63  ;;  %v2760_v5 = vpop.f32.mrb[51].mxu0 }
0x188c   :  { %2764 = vmatmul.mubr.msk.bf16.vlgmr.msra.gmra.mrb[52].mxu0 %vm574_vm2, %v2073_v4  ;;  %vm2231_vm2 = vcmask 523264  }
0x188d   :  { %2783 = vmatprep.mubr.msk.bf16.mxu0 %vm3012_vm1, %v3011_v1  ;;  %2776 = vmatpush3.bf16.msra.mxu0 %v2445_v58 }
0x188e   :  { %2777 = vmatprep.subr.bf16.mxu0 %v3011_v1 }
0x1891   :  { %2778 = vmatpush3.bf16.msra.mxu0 %v2446_v23 }
0x1892   :  { %2779 = vmatprep.subr.bf16.mxu0 %v3011_v1 }
0x1895   :  { %2780 = vmatpush3.bf16.msra.mxu0 %v2447_v47 }
0x1896   :  { %2781 = vmatprep.subr.bf16.mxu0 %v3011_v1 }
0x1899   :  { %2782 = vmatpush3.bf16.msra.mxu0 %v2448_v50 }
0x195f   :  { %v2114_v40 = vpop.f32.mrb[52].mxu0 }
0x1960   :  { %v2121_v6 = vadd.f32 %v2114_v40, %v1942_v59  ;;  %v2765_v7 = vpop.f32.mrb[53].mxu0 }
0x1961   :  { %v2117_v11 = vpop.f32.mrb[54].mxu0  ;;  %v83_v7 = vld [vmem:[#allocation5 + $0x3c] sm:$0xf] }
0x1962   :  { %v3675_v46 = vadd.f32 %v2121_v6, %v3502_v25  ;;  %v2122_v15 = vadd.f32 %v2117_v11, %v1943_v62  ;;  %v2766_v9 = vpop.f32.mrb[55].mxu0  ;;  %v71_v25 = vld [vmem:[#allocation5 + $0x34] sm:$0xf]  ;;  %v82_v6 = vld [vmem:[#allocation5 + $0x1c] sm:$0xf] }
0x1963   :  { %v2442_v28 = vcombine.low %v70_v19, %v71_v25  ;;  %v2450_v11 = vcombine.low %v82_v6, %v83_v7  ;;  %v2296_v25 = vsub.s32 3, %v3088_v2 }
0x1964   :  { %v3678_v16 = vadd.f32 %v2122_v15, %v3505_v29  ;;  %v2125_v17 = vmul.f32 %v3675_v46, %v3675_v46  ;;  %v2443_v29 = vcombine.low %v72_v48, %v73_v52  ;;  %v85_v15 = vld [vmem:[#allocation5 + $0x7c] sm:$0xf] }
0x1965   :  { %2768 = vmatpush3.bf16.msra.mxu1 %v2442_v28  ;;  %v2297_v48 = vrot.slane %v2931_v35, %v2296_v25 }
0x1966   :  { %v2127_v18 = vsel %vm491_vm0, %v2125_v17, 0.0  ;;  %v2126_v10 = vmul.f32 %v3678_v16, %v3678_v16  ;;  %2769 = vmatprep.subr.bf16.mxu1 %v3011_v1 }
0x1967   :  { %2128 = vadd.xlane.f32.xlu1 %v2127_v18 }
0x1968   :  { %v2130_v3 = vsel %vm491_vm0, %v2126_v10, 0.0 }
0x1969   :  { %2131 = vadd.xlane.f32.xlu0 %v2130_v3  ;;  %2770 = vmatpush3.bf16.msra.mxu1 %v2443_v29 }
0x196a   :  { %2787 = vmatprep.subr.bf16.mxu1 %v3011_v1 }
0x19f4   :  { %v2129_v14 = vpop.xlane.xlu1 %2128 }
0x19f5   :  { %v2133_v24 = vmul.f32 0.03125, %v2129_v14 }
0x19f6   :  { %v2132_v26 = vpop.xlane.xlu0 %2131 }
0x19f7   :  { %v2135_v27 = vadd.f32 1e-06, %v2133_v24  ;;  %v2134_v8 = vmul.f32 0.03125, %v2132_v26 }
0x19f9   :  { %2923 = vrsqrt.f32 %v2135_v27  ;;  %v2136_v30 = vadd.f32 1e-06, %v2134_v8 }
0x19fb   :  { %2925 = vrsqrt.f32 %v2136_v30 }
0x1a03   :  { %v2924_v32 = vpop.eup %2923 }
0x1a04   :  { %v2139_v34 = vmul.f32 %v2924_v32, %v3675_v46 }
0x1a05   :  { %v2926_v36 = vpop.eup %2925 }
0x1a06   :  { %v2140_v37 = vmul.f32 %v2926_v36, %v3678_v16  ;;  %v2145_v38 = vmul.f32 %v2144_v13, %v2139_v34 }
0x1a08   :  { %v2146_v12 = vmul.f32 %v2144_v13, %v2140_v37 }
0x1a0a   :  { %v2147_v39 = vpack.c.bf16 %v2146_v12, %v2145_v38 }
0x1a0c   :  { %2772 = vmatmul.mubr.msk.bf16.vlgmr.msra.gmra.mrb[56].mxu1 %vm491_vm0, %v2147_v39 }
0x1a0d   :  { %2791 = vmatprep.mubr.msk.bf16.mxu1 %vm3012_vm1, %v3011_v1  ;;  %2788 = vmatpush3.bf16.msra.mxu1 %v2450_v11 }
0x1a0e   :  { %2789 = vmatprep.subr.bf16.mxu1 %v3011_v1 }
0x1adf   :  { %v2197_v51 = vpop.f32.mrb[56].mxu1 }
0x1ae0   :  { %v2773_v53 = vpop.f32.mrb[57].mxu1  ;;  %v2204_v55 = vmax.f32 %v2197_v51, 0.0 }
0x1ae1   :  { %v2200_v54 = vpop.f32.mrb[58].mxu1 }
0x1ae2   :  { %v2205_v56 = vmax.f32 %v2200_v54, 0.0  ;;  %v2774_v57 = vpop.f32.mrb[59].mxu1 }
0x1ae4   :  { %v2206_v59 = vpack.c.bf16 %v2205_v56, %v2204_v55 }
0x1ae6   :  { %2784 = vmatmul.mubr.msk.bf16.vlgmr.msra.gmra.mrb[56].mxu0 %vm2231_vm2, %v2206_v59 }
0x1bb9   :  { %v2269_v60 = vpop.f32.mrb[56].mxu0 }
0x1bba   :  { %v2276_v61 = vadd.f32 %v2269_v60, %v3675_v46  ;;  %v2785_v62 = vpop.f32.mrb[57].mxu0  ;;  %v84_v46 = vld [vmem:[#allocation5 + $0x5c] sm:$0xf] }
0x1bbb   :  { %v2272_v44 = vpop.f32.mrb[58].mxu0  ;;  %v2451_v9 = vcombine.low %v84_v46, %v85_v15 }
0x1bbc   :  { %v2277_v63 = vadd.f32 %v2272_v44, %v3678_v16  ;;  %v2786_v33 = vpop.f32.mrb[59].mxu0  ;;  %v2278_v0 = vmul.f32 %v2276_v61, %v2276_v61 }
0x1bbd   :  { %2790 = vmatpush3.bf16.msra.mxu1 %v2451_v9 }
0x1bbe   :  { %v2280_v4 = vsel %vm491_vm0, %v2278_v0, 0.0  ;;  %v2279_v5 = vmul.f32 %v2277_v63, %v2277_v63 }
0x1bbf   :  { %2281 = vadd.xlane.f32.xlu0 %v2280_v4 }
0x1bc0   :  { %v2283_v40 = vsel %vm491_vm0, %v2279_v5, 0.0 }
0x1bc1   :  { %2284 = vadd.xlane.f32.xlu1 %v2283_v40 }
0x1c4c   :  { %v2282_v16 = vpop.xlane.xlu0 %2281 }
0x1c4d   :  { %v2286_v17 = vmul.f32 0.03125, %v2282_v16 }
0x1c4e   :  { %v2285_v18 = vpop.xlane.xlu1 %2284 }
0x1c4f   :  { %v2288_v10 = vadd.f32 1e-06, %v2286_v17  ;;  %v2287_v3 = vmul.f32 0.03125, %v2285_v18 }
0x1c51   :  { %2927 = vrsqrt.f32 %v2288_v10  ;;  %v2289_v19 = vadd.f32 1e-06, %v2287_v3 }
0x1c53   :  { %2929 = vrsqrt.f32 %v2289_v19 }
0x1c5b   :  { %v2928_v28 = vpop.eup %2927 }
0x1c5c   :  { %v2292_v52 = vmul.f32 %v2928_v28, %v2276_v61 }
0x1c5d   :  { %v2930_v29 = vpop.eup %2929 }
0x1c5e   :  { %v2293_v43 = vmul.f32 %v2930_v29, %v2277_v63  ;;  %v2298_v1 = vmul.f32 %v2297_v48, %v2292_v52 }
0x1c60   :  { %v2299_v20 = vmul.f32 %v2297_v48, %v2293_v43 }
0x1c62   :  { %v2300_v21 = vpack.c.bf16 %v2299_v20, %v2298_v1 }
0x1c64   :  { %2792 = vmatmul.mubr.msk.bf16.vlgmr.msra.gmra.mrb[60].mxu1 %vm491_vm0, %v2300_v21 }
0x1d37   :  { %v2350_v58 = vpop.f32.mrb[60].mxu1 }
0x1d38   :  { %2357 = vst [vmem:[#allocation8] sm:$0xff] %v2350_v58  ;;  %v2793_v22 = vpop.f32.mrb[61].mxu1 }
0x1d39   :  { %v2353_v23 = vpop.f32.mrb[62].mxu1 }
0x1d3a   :  { %2358 = vst [vmem:[#allocation8 + $0x8] sm:$0xff] %v2353_v23  ;;  %v2794_v14 = vpop.f32.mrb[63].mxu1 }
0x1d3b   :  { %2989 = shalt.err (!%p2986_p8)
}
0x1d3c   :  { %s2990_s16 = scalar_lea.hbm %s3724_s6, 256 }
0x1d3d   :  { %p2991_p9 = scmp.ne.s32.totalorder %s3724_s6, %s2990_s16  ;;  %p2994_p10 = scmp.lt.u32.totalorder %s2990_s16, %s3724_s6 }
0x1d3f   :  { %p2996_p11 = pnand %p2994_p10, %p2991_p9 }
0x1d41   :  { %2999 = shalt.err (!%p2996_p11)
}
0x1d42   :  { %s3026_s21 = smov 128   ;;  %s3027_s22 = smov 8  }
0x1d43   :  { %2370 = dma.vmem_to_hbm [thread:$0]  %s2365_s12, 256, %s3724_s6, [#allocation7], %s3026_s21, %s3026_s21, %s3027_s22  }
0x1d44   :  { %3004 = dma.done.wait [#allocation7], 256  }
0x1d45   :  { %3005 = vsyncadd [#allocation7], 4294967040 }
0x1d46   :  { %2374 = vsyncpa [#allocation6], 1 }
0x1d47   :  { %2375 = vsyncpa [#allocation7], 1 }

</bundles_post_ra>
